<compile_context>
chip_gen: v6e
topology: v6e:2x2x1
jax: 0.10.0
libtpu: 0.0.40
codegen_flags: <defaults>
</compile_context>

<pallas_src>
import functools

import jax
import jax.numpy as jnp
from jax.experimental import pallas as pl
from jax.experimental.pallas import tpu as pltpu


# ----------------------------------------------------------------------------
# Pallas kernel: full decoder forward (GRU stack + MLP head) in one program.
# ----------------------------------------------------------------------------
def _decoder_kernel(x_ref,
                    wih_ref, whh_ref, bi_ref, bhh_ref,
                    w1_ref, b1_ref, w2_ref, b2_ref,
                    out_ref,
                    gi_ref, seq_ref,
                    *, num_layers, seq_len, batch_pad, hidden):
    H = hidden
    T = seq_len
    Bp = batch_pad
    f32 = jnp.float32

    # Hoisted, packed input->gates matmul for layer 0 over the whole slab:
    # ONE (T*Bp, H) @ (H, 128) MXU pass, bias folded, lane-dense (128) store.
    gi_ref[...] = (jnp.dot(x_ref[...], wih_ref[0],
                           preferred_element_type=f32) + bi_ref[0])

    def gru_cell(gi, gh, h):
        # gi / gh are (Bp, 128): lanes [0:H)=r, [H:2H)=z, [2H:3H)=n.
        # gh already contains b_hn in its n lanes (packed recurrent bias).
        r = jax.nn.sigmoid(gi[:, 0:H] + gh[:, 0:H])
        z = jax.nn.sigmoid(gi[:, H:2 * H] + gh[:, H:2 * H])
        n = jnp.tanh(gi[:, 2 * H:3 * H] + r * gh[:, 2 * H:3 * H])
        return (1.0 - z) * n + z * h

    prev_outs = None                              # previous layer's h_t values
    for l in range(num_layers):                   # static layer loop
        if l > 0:
            w_ih = wih_ref[l]                     # (H, 128)
            b_i = bi_ref[l]                       # (1, 128)
        w_hh = whh_ref[l]                         # (H, 128)
        b_hh = bhh_ref[l]                         # (1, 128)

        h = jnp.zeros((Bp, H), f32)
        outs = []
        for t in range(T):                        # fully unrolled (T small)
            if l == 0:
                gi = gi_ref[pl.ds(t * Bp, Bp), :]            # (Bp, 128)
            else:
                # Per-step input transform from the previous layer's h_t
                # (kept as a value): enables the layer wavefront.
                gi = jnp.dot(prev_outs[t], w_ih,
                             preferred_element_type=f32) + b_i
            gh = jnp.dot(h, w_hh, preferred_element_type=f32) + b_hh
            h = gru_cell(gi, gh, h)
            if l == num_layers - 1:
                seq_ref[pl.ds(t * Bp, Bp), :] = h            # (Bp, H) store
            else:
                outs.append(h)
        prev_outs = outs

    # ---- MLP head: one batched matmul over the whole (T*Bp, H) slab ----
    hs = seq_ref[...]
    a = jnp.tanh(jnp.dot(hs, w1_ref[...],
                         preferred_element_type=f32) + b1_ref[...])
    out_ref[...] = (jnp.dot(a, w2_ref[...],
                            preferred_element_type=f32)
                    + b2_ref[...]).astype(out_ref.dtype)


# ----------------------------------------------------------------------------
# Wrapper: parameter packing + pallas_call
# ----------------------------------------------------------------------------
def decoder_forward(x, params, *, latent_dim, obs_dim, hidden_units,
                    hidden_layers):
    """x: (B, T, latent_dim) float32 -> (B, T, obs_dim) float32."""
    B, T, L = x.shape
    H = hidden_units
    assert L == latent_dim and latent_dim <= H
    assert 3 * H <= 128, "packed-gate layout assumes 3H fits in one 128-lane vreg"
    H1 = H - 5
    GW = 128                                       # packed gate width (lanes)

    Bp = max(8, -(-B // 8) * 8)                    # batch -> sublane width
    H1p = -(-H1 // 128) * 128                      # head hidden -> lane-dense
    OBSp = -(-obs_dim // 128) * 128                # output      -> lane-dense

    # Input: pad batch->Bp, feature->H (zeros), time-major flat (T*Bp, H).
    x_pad = jnp.zeros((Bp, T, H), jnp.float32).at[:B, :, :L].set(
        x.astype(jnp.float32))
    x_tm = jnp.transpose(x_pad, (1, 0, 2)).reshape(T * Bp, H)

    # Packed GRU params: per layer one (H, 128) input-gate matrix, one (H, 128)
    # recurrent-gate matrix, one (1, 128) folded input bias (b_ir+b_hr,
    # b_iz+b_hz, b_in), one (1, 128) recurrent bias (zeros, zeros, b_hn).
    wih_l, whh_l, bi_l, bhh_l = [], [], [], []
    for l in range(hidden_layers):
        w_ih = params[f"weight_ih_l{l}"].astype(jnp.float32)   # (3H, in_dim)
        w_hh = params[f"weight_hh_l{l}"].astype(jnp.float32)   # (3H, H)
        b_ih = params[f"bias_ih_l{l}"].astype(jnp.float32)     # (3H,)
        b_hh = params[f"bias_hh_l{l}"].astype(jnp.float32)     # (3H,)
        in_dim = w_ih.shape[1]
        wih = jnp.zeros((H, GW), jnp.float32).at[:in_dim, :3 * H].set(w_ih.T)
        whh = jnp.zeros((H, GW), jnp.float32).at[:, :3 * H].set(w_hh.T)
        bi = jnp.zeros((1, GW), jnp.float32)
        bi = bi.at[0, 0:2 * H].set(b_ih[0:2 * H] + b_hh[0:2 * H])
        bi = bi.at[0, 2 * H:3 * H].set(b_ih[2 * H:3 * H])
        bhh = jnp.zeros((1, GW), jnp.float32).at[0, 2 * H:3 * H].set(
            b_hh[2 * H:3 * H])
        wih_l.append(wih); whh_l.append(whh); bi_l.append(bi); bhh_l.append(bhh)
    wih_all = jnp.stack(wih_l)                     # (L, H, 128)
    whh_all = jnp.stack(whh_l)                     # (L, H, 128)
    bi_all = jnp.stack(bi_l)                       # (L, 1, 128)
    bhh_all = jnp.stack(bhh_l)                     # (L, 1, 128)

    # MLP head, zero-padded to lane-dense widths (pads contribute exactly 0).
    w1 = jnp.zeros((H, H1p), jnp.float32).at[:, :H1].set(
        params["h1_weight"].T.astype(jnp.float32))
    b1 = jnp.zeros((1, H1p), jnp.float32).at[:, :H1].set(
        params["h1_bias"].astype(jnp.float32))
    w2 = jnp.zeros((H1p, OBSp), jnp.float32).at[:H1, :obs_dim].set(
        params["h2_weight"].T.astype(jnp.float32))
    b2 = jnp.zeros((1, OBSp), jnp.float32).at[:, :obs_dim].set(
        params["h2_bias"].astype(jnp.float32))

    kernel = functools.partial(
        _decoder_kernel, num_layers=hidden_layers, seq_len=T,
        batch_pad=Bp, hidden=H)

    vmem = pl.BlockSpec(memory_space=pltpu.MemorySpace.VMEM)

    out_flat = pl.pallas_call(
        kernel,
        out_shape=jax.ShapeDtypeStruct((T * Bp, OBSp), jnp.float32),
        in_specs=[vmem] * 9,
        out_specs=vmem,
        scratch_shapes=[
            pltpu.VMEM((T * Bp, GW), jnp.float32),   # packed gi slab (layer 0)
            pltpu.VMEM((T * Bp, H), jnp.float32),    # last-layer outputs
        ],
    )(x_tm, wih_all, whh_all, bi_all, bhh_all, w1, b1, w2, b2)

    out = out_flat.reshape(T, Bp, OBSp)
    return jnp.transpose(out, (1, 0, 2))[:B, :, :obs_dim]


# ----------------------------------------------------------------------------
# Deterministic parameter init (PyTorch-style uniform(-1/sqrt(H), 1/sqrt(H)))
# ----------------------------------------------------------------------------
def init_params(key, latent_dim, obs_dim, hidden_units, hidden_layers):
    H = hidden_units
    k = 1.0 / jnp.sqrt(H)
    params = {}

    def u(key, shape):
        return jax.random.uniform(key, shape, jnp.float32, -k, k)

    keys = jax.random.split(key, 4 * hidden_layers + 4)
    idx = 0
    for l in range(hidden_layers):
        in_dim = latent_dim if l == 0 else H
        params[f"weight_ih_l{l}"] = u(keys[idx], (3 * H, in_dim)); idx += 1
        params[f"weight_hh_l{l}"] = u(keys[idx], (3 * H, H));      idx += 1
        params[f"bias_ih_l{l}"] = u(keys[idx], (3 * H,));          idx += 1
        params[f"bias_hh_l{l}"] = u(keys[idx], (3 * H,));          idx += 1
    params["h1_weight"] = u(keys[idx], (H - 5, H));   idx += 1
    params["h1_bias"] = u(keys[idx], (H - 5,));       idx += 1
    params["h2_weight"] = u(keys[idx], (obs_dim, H - 5)); idx += 1
    params["h2_bias"] = u(keys[idx], (obs_dim,));     idx += 1
    return params


# ----------------------------------------------------------------------------
# Pure-JAX reference (mirrors torch.nn.GRU + Linear/Tanh/Linear)
# ----------------------------------------------------------------------------
def decoder_reference(x, params, *, latent_dim, obs_dim, hidden_units,
                      hidden_layers):
    B, T, _ = x.shape
    H = hidden_units
    layer_in = x.astype(jnp.float32)
    for l in range(hidden_layers):
        w_ih = params[f"weight_ih_l{l}"]
        w_hh = params[f"weight_hh_l{l}"]
        b_ih = params[f"bias_ih_l{l}"]
        b_hh = params[f"bias_hh_l{l}"]
        h = jnp.zeros((B, H), jnp.float32)
        outs = []
        for t in range(T):
            xt = layer_in[:, t, :]
            gi = xt @ w_ih.T + b_ih
            gh = h @ w_hh.T + b_hh
            r = jax.nn.sigmoid(gi[:, :H] + gh[:, :H])
            z = jax.nn.sigmoid(gi[:, H:2 * H] + gh[:, H:2 * H])
            n = jnp.tanh(gi[:, 2 * H:] + r * gh[:, 2 * H:])
            h = (1.0 - z) * n + z * h
            outs.append(h)
        layer_in = jnp.stack(outs, axis=1)
    a = jnp.tanh(layer_in @ params["h1_weight"].T + params["h1_bias"])
    return a @ params["h2_weight"].T + params["h2_bias"]


if __name__ == "__main__":
    latent_dim, obs_dim = 4, 4
    hidden_units, hidden_layers = 32, 2
    B, T = 2, 8

    key = jax.random.PRNGKey(0)
    key_x, key_p = jax.random.split(key)
    x = jax.random.normal(key_x, (B, T, latent_dim), jnp.float32)
    params = init_params(key_p, latent_dim, obs_dim, hidden_units,
                         hidden_layers)

    y = decoder_forward(x, params, latent_dim=latent_dim, obs_dim=obs_dim,
                        hidden_units=hidden_units, hidden_layers=hidden_layers)
    y = jax.block_until_ready(y)

    y_ref = decoder_reference(x, params, latent_dim=latent_dim,
                              obs_dim=obs_dim, hidden_units=hidden_units,
                              hidden_layers=hidden_layers)

    assert y.shape == (B, T, obs_dim)
    assert jnp.allclose(y, y_ref, atol=1e-4, rtol=1e-4), (
        f"max abs err {jnp.max(jnp.abs(y - y_ref))}")
    print("KERNEL_OK")
</pallas_src>

<mosaic_0001>
module attributes {stable_mosaic.version = 11 : i64} {
  func.func @_decoder_kernel(%arg0: memref<64x32xf32, #tpu.memory_space<vmem>>, %arg1: memref<2x32x128xf32, #tpu.memory_space<vmem>>, %arg2: memref<2x32x128xf32, #tpu.memory_space<vmem>>, %arg3: memref<2x1x128xf32, #tpu.memory_space<vmem>>, %arg4: memref<2x1x128xf32, #tpu.memory_space<vmem>>, %arg5: memref<32x128xf32, #tpu.memory_space<vmem>>, %arg6: memref<1x128xf32, #tpu.memory_space<vmem>>, %arg7: memref<128x128xf32, #tpu.memory_space<vmem>>, %arg8: memref<1x128xf32, #tpu.memory_space<vmem>>, %arg9: memref<64x128xf32, #tpu.memory_space<vmem>>, %arg10: memref<64x128xf32, #tpu.memory_space<vmem>>, %arg11: memref<64x32xf32, #tpu.memory_space<vmem>>) attributes {dimension_semantics = [], scalar_prefetch = 0 : i64, scratch_operands = 2 : i64, tpu.core_type = #tpu.core_type<tc>} {
    %c0 = arith.constant 0 : index
    %c0_0 = arith.constant 0 : index
    %0 = vector.load %arg0[%c0, %c0_0] : memref<64x32xf32, #tpu.memory_space<vmem>>, vector<64x32xf32>
    %c0_1 = arith.constant 0 : index
    %c0_2 = arith.constant 0 : index
    %c0_3 = arith.constant 0 : index
    %1 = vector.load %arg1[%c0_1, %c0_2, %c0_3] : memref<2x32x128xf32, #tpu.memory_space<vmem>>, vector<1x32x128xf32>
    %2 = vector.shape_cast %1 : vector<1x32x128xf32> to vector<32x128xf32>
    %cst = arith.constant dense<0.000000e+00> : vector<64x128xf32>
    %3 = tpu.matmul %0, %2, %cst {dimension_numbers = #tpu.dot_dimension_numbers<[1], [0], [0], [1], [0, 0, 1, 1], [], []>} : vector<64x32xf32>, vector<32x128xf32>, vector<64x128xf32> -> vector<64x128xf32>
    %c0_4 = arith.constant 0 : index
    %c0_5 = arith.constant 0 : index
    %c0_6 = arith.constant 0 : index
    %4 = vector.load %arg3[%c0_4, %c0_5, %c0_6] : memref<2x1x128xf32, #tpu.memory_space<vmem>>, vector<1x1x128xf32>
    %5 = vector.shape_cast %4 : vector<1x1x128xf32> to vector<1x128xf32>
    %6 = vector.broadcast %5 : vector<1x128xf32> to vector<64x128xf32>
    %7 = arith.addf %3, %6 : vector<64x128xf32>
    %c0_7 = arith.constant 0 : index
    %c0_8 = arith.constant 0 : index
    %8 = vector.load %arg10[%c0_7, %c0_8] : memref<64x128xf32, #tpu.memory_space<vmem>>, vector<64x128xf32>
    tpu.vector_store %arg10[%c0_7, %c0_8], %7 {strides = array<i32>} : memref<64x128xf32, #tpu.memory_space<vmem>>, vector<64x128xf32>,
    %c0_9 = arith.constant 0 : index
    %c0_10 = arith.constant 0 : index
    %c0_11 = arith.constant 0 : index
    %9 = vector.load %arg2[%c0_9, %c0_10, %c0_11] : memref<2x32x128xf32, #tpu.memory_space<vmem>>, vector<1x32x128xf32>
    %10 = vector.shape_cast %9 : vector<1x32x128xf32> to vector<32x128xf32>
    %c0_12 = arith.constant 0 : index
    %c0_13 = arith.constant 0 : index
    %c0_14 = arith.constant 0 : index
    %11 = vector.load %arg4[%c0_12, %c0_13, %c0_14] : memref<2x1x128xf32, #tpu.memory_space<vmem>>, vector<1x1x128xf32>
    %12 = vector.shape_cast %11 : vector<1x1x128xf32> to vector<1x128xf32>
    %cst_15 = arith.constant 0.000000e+00 : f32
    %13 = vector.broadcast %cst_15 : f32 to vector<8x32xf32>
    %c0_16 = arith.constant 0 : index
    %c0_17 = arith.constant 0 : index
    %14 = vector.load %arg10[%c0_16, %c0_17] : memref<64x128xf32, #tpu.memory_space<vmem>>, vector<8x128xf32>
    %cst_18 = arith.constant dense<0.000000e+00> : vector<8x128xf32>
    %15 = tpu.matmul %13, %10, %cst_18 {dimension_numbers = #tpu.dot_dimension_numbers<[1], [0], [0], [1], [0, 0, 1, 1], [], []>} : vector<8x32xf32>, vector<32x128xf32>, vector<8x128xf32> -> vector<8x128xf32>
    %16 = vector.broadcast %12 : vector<1x128xf32> to vector<8x128xf32>
    %17 = arith.addf %15, %16 : vector<8x128xf32>
    %18 = vector.extract_strided_slice %14 {offsets = [0, 0], sizes = [8, 32], strides = [1, 1]} : vector<8x128xf32> to vector<8x32xf32>
    %19 = vector.extract_strided_slice %17 {offsets = [0, 0], sizes = [8, 32], strides = [1, 1]} : vector<8x128xf32> to vector<8x32xf32>
    %20 = arith.addf %18, %19 : vector<8x32xf32>
    %21 = arith.negf %20 : vector<8x32xf32>
    %22 = math.exp %21 : vector<8x32xf32>
    %cst_19 = arith.constant 1.000000e+00 : f32
    %23 = vector.broadcast %cst_19 : f32 to vector<8x32xf32>
    %24 = arith.addf %23, %22 : vector<8x32xf32>
    %25 = arith.divf %23, %24 : vector<8x32xf32>
    %26 = vector.extract_strided_slice %14 {offsets = [0, 32], sizes = [8, 32], strides = [1, 1]} : vector<8x128xf32> to vector<8x32xf32>
    %27 = vector.extract_strided_slice %17 {offsets = [0, 32], sizes = [8, 32], strides = [1, 1]} : vector<8x128xf32> to vector<8x32xf32>
    %28 = arith.addf %26, %27 : vector<8x32xf32>
    %29 = arith.negf %28 : vector<8x32xf32>
    %30 = math.exp %29 : vector<8x32xf32>
    %cst_20 = arith.constant 1.000000e+00 : f32
    %31 = vector.broadcast %cst_20 : f32 to vector<8x32xf32>
    %32 = arith.addf %31, %30 : vector<8x32xf32>
    %33 = arith.divf %31, %32 : vector<8x32xf32>
    %34 = vector.extract_strided_slice %14 {offsets = [0, 64], sizes = [8, 32], strides = [1, 1]} : vector<8x128xf32> to vector<8x32xf32>
    %35 = vector.extract_strided_slice %17 {offsets = [0, 64], sizes = [8, 32], strides = [1, 1]} : vector<8x128xf32> to vector<8x32xf32>
    %36 = arith.mulf %25, %35 : vector<8x32xf32>
    %37 = arith.addf %34, %36 : vector<8x32xf32>
    %38 = math.tanh %37 : vector<8x32xf32>
    %cst_21 = arith.constant 1.000000e+00 : f32
    %39 = vector.broadcast %cst_21 : f32 to vector<8x32xf32>
    %40 = arith.subf %39, %33 : vector<8x32xf32>
    %41 = arith.mulf %40, %38 : vector<8x32xf32>
    %42 = arith.mulf %33, %13 : vector<8x32xf32>
    %43 = arith.addf %41, %42 : vector<8x32xf32>
    %c8 = arith.constant 8 : index
    %c0_22 = arith.constant 0 : index
    %44 = vector.load %arg10[%c8, %c0_22] : memref<64x128xf32, #tpu.memory_space<vmem>>, vector<8x128xf32>
    %cst_23 = arith.constant dense<0.000000e+00> : vector<8x128xf32>
    %45 = tpu.matmul %43, %10, %cst_23 {dimension_numbers = #tpu.dot_dimension_numbers<[1], [0], [0], [1], [0, 0, 1, 1], [], []>} : vector<8x32xf32>, vector<32x128xf32>, vector<8x128xf32> -> vector<8x128xf32>
    %46 = vector.broadcast %12 : vector<1x128xf32> to vector<8x128xf32>
    %47 = arith.addf %45, %46 : vector<8x128xf32>
    %48 = vector.extract_strided_slice %44 {offsets = [0, 0], sizes = [8, 32], strides = [1, 1]} : vector<8x128xf32> to vector<8x32xf32>
    %49 = vector.extract_strided_slice %47 {offsets = [0, 0], sizes = [8, 32], strides = [1, 1]} : vector<8x128xf32> to vector<8x32xf32>
    %50 = arith.addf %48, %49 : vector<8x32xf32>
    %51 = arith.negf %50 : vector<8x32xf32>
    %52 = math.exp %51 : vector<8x32xf32>
    %cst_24 = arith.constant 1.000000e+00 : f32
    %53 = vector.broadcast %cst_24 : f32 to vector<8x32xf32>
    %54 = arith.addf %53, %52 : vector<8x32xf32>
    %55 = arith.divf %53, %54 : vector<8x32xf32>
    %56 = vector.extract_strided_slice %44 {offsets = [0, 32], sizes = [8, 32], strides = [1, 1]} : vector<8x128xf32> to vector<8x32xf32>
    %57 = vector.extract_strided_slice %47 {offsets = [0, 32], sizes = [8, 32], strides = [1, 1]} : vector<8x128xf32> to vector<8x32xf32>
    %58 = arith.addf %56, %57 : vector<8x32xf32>
    %59 = arith.negf %58 : vector<8x32xf32>
    %60 = math.exp %59 : vector<8x32xf32>
    %cst_25 = arith.constant 1.000000e+00 : f32
    %61 = vector.broadcast %cst_25 : f32 to vector<8x32xf32>
    %62 = arith.addf %61, %60 : vector<8x32xf32>
    %63 = arith.divf %61, %62 : vector<8x32xf32>
    %64 = vector.extract_strided_slice %44 {offsets = [0, 64], sizes = [8, 32], strides = [1, 1]} : vector<8x128xf32> to vector<8x32xf32>
    %65 = vector.extract_strided_slice %47 {offsets = [0, 64], sizes = [8, 32], strides = [1, 1]} : vector<8x128xf32> to vector<8x32xf32>
    %66 = arith.mulf %55, %65 : vector<8x32xf32>
    %67 = arith.addf %64, %66 : vector<8x32xf32>
    %68 = math.tanh %67 : vector<8x32xf32>
    %cst_26 = arith.constant 1.000000e+00 : f32
    %69 = vector.broadcast %cst_26 : f32 to vector<8x32xf32>
    %70 = arith.subf %69, %63 : vector<8x32xf32>
    %71 = arith.mulf %70, %68 : vector<8x32xf32>
    %72 = arith.mulf %63, %43 : vector<8x32xf32>
    %73 = arith.addf %71, %72 : vector<8x32xf32>
    %c16 = arith.constant 16 : index
    %c0_27 = arith.constant 0 : index
    %74 = vector.load %arg10[%c16, %c0_27] : memref<64x128xf32, #tpu.memory_space<vmem>>, vector<8x128xf32>
    %cst_28 = arith.constant dense<0.000000e+00> : vector<8x128xf32>
    %75 = tpu.matmul %73, %10, %cst_28 {dimension_numbers = #tpu.dot_dimension_numbers<[1], [0], [0], [1], [0, 0, 1, 1], [], []>} : vector<8x32xf32>, vector<32x128xf32>, vector<8x128xf32> -> vector<8x128xf32>
    %76 = vector.broadcast %12 : vector<1x128xf32> to vector<8x128xf32>
    %77 = arith.addf %75, %76 : vector<8x128xf32>
    %78 = vector.extract_strided_slice %74 {offsets = [0, 0], sizes = [8, 32], strides = [1, 1]} : vector<8x128xf32> to vector<8x32xf32>
    %79 = vector.extract_strided_slice %77 {offsets = [0, 0], sizes = [8, 32], strides = [1, 1]} : vector<8x128xf32> to vector<8x32xf32>
    %80 = arith.addf %78, %79 : vector<8x32xf32>
    %81 = arith.negf %80 : vector<8x32xf32>
    %82 = math.exp %81 : vector<8x32xf32>
    %cst_29 = arith.constant 1.000000e+00 : f32
    %83 = vector.broadcast %cst_29 : f32 to vector<8x32xf32>
    %84 = arith.addf %83, %82 : vector<8x32xf32>
    %85 = arith.divf %83, %84 : vector<8x32xf32>
    %86 = vector.extract_strided_slice %74 {offsets = [0, 32], sizes = [8, 32], strides = [1, 1]} : vector<8x128xf32> to vector<8x32xf32>
    %87 = vector.extract_strided_slice %77 {offsets = [0, 32], sizes = [8, 32], strides = [1, 1]} : vector<8x128xf32> to vector<8x32xf32>
    %88 = arith.addf %86, %87 : vector<8x32xf32>
    %89 = arith.negf %88 : vector<8x32xf32>
    %90 = math.exp %89 : vector<8x32xf32>
    %cst_30 = arith.constant 1.000000e+00 : f32
    %91 = vector.broadcast %cst_30 : f32 to vector<8x32xf32>
    %92 = arith.addf %91, %90 : vector<8x32xf32>
    %93 = arith.divf %91, %92 : vector<8x32xf32>
    %94 = vector.extract_strided_slice %74 {offsets = [0, 64], sizes = [8, 32], strides = [1, 1]} : vector<8x128xf32> to vector<8x32xf32>
    %95 = vector.extract_strided_slice %77 {offsets = [0, 64], sizes = [8, 32], strides = [1, 1]} : vector<8x128xf32> to vector<8x32xf32>
    %96 = arith.mulf %85, %95 : vector<8x32xf32>
    %97 = arith.addf %94, %96 : vector<8x32xf32>
    %98 = math.tanh %97 : vector<8x32xf32>
    %cst_31 = arith.constant 1.000000e+00 : f32
    %99 = vector.broadcast %cst_31 : f32 to vector<8x32xf32>
    %100 = arith.subf %99, %93 : vector<8x32xf32>
    %101 = arith.mulf %100, %98 : vector<8x32xf32>
    %102 = arith.mulf %93, %73 : vector<8x32xf32>
    %103 = arith.addf %101, %102 : vector<8x32xf32>
    %c24 = arith.constant 24 : index
    %c0_32 = arith.constant 0 : index
    %104 = vector.load %arg10[%c24, %c0_32] : memref<64x128xf32, #tpu.memory_space<vmem>>, vector<8x128xf32>
    %cst_33 = arith.constant dense<0.000000e+00> : vector<8x128xf32>
    %105 = tpu.matmul %103, %10, %cst_33 {dimension_numbers = #tpu.dot_dimension_numbers<[1], [0], [0], [1], [0, 0, 1, 1], [], []>} : vector<8x32xf32>, vector<32x128xf32>, vector<8x128xf32> -> vector<8x128xf32>
    %106 = vector.broadcast %12 : vector<1x128xf32> to vector<8x128xf32>
    %107 = arith.addf %105, %106 : vector<8x128xf32>
    %108 = vector.extract_strided_slice %104 {offsets = [0, 0], sizes = [8, 32], strides = [1, 1]} : vector<8x128xf32> to vector<8x32xf32>
    %109 = vector.extract_strided_slice %107 {offsets = [0, 0], sizes = [8, 32], strides = [1, 1]} : vector<8x128xf32> to vector<8x32xf32>
    %110 = arith.addf %108, %109 : vector<8x32xf32>
    %111 = arith.negf %110 : vector<8x32xf32>
    %112 = math.exp %111 : vector<8x32xf32>
    %cst_34 = arith.constant 1.000000e+00 : f32
    %113 = vector.broadcast %cst_34 : f32 to vector<8x32xf32>
    %114 = arith.addf %113, %112 : vector<8x32xf32>
    %115 = arith.divf %113, %114 : vector<8x32xf32>
    %116 = vector.extract_strided_slice %104 {offsets = [0, 32], sizes = [8, 32], strides = [1, 1]} : vector<8x128xf32> to vector<8x32xf32>
    %117 = vector.extract_strided_slice %107 {offsets = [0, 32], sizes = [8, 32], strides = [1, 1]} : vector<8x128xf32> to vector<8x32xf32>
    %118 = arith.addf %116, %117 : vector<8x32xf32>
    %119 = arith.negf %118 : vector<8x32xf32>
    %120 = math.exp %119 : vector<8x32xf32>
    %cst_35 = arith.constant 1.000000e+00 : f32
    %121 = vector.broadcast %cst_35 : f32 to vector<8x32xf32>
    %122 = arith.addf %121, %120 : vector<8x32xf32>
    %123 = arith.divf %121, %122 : vector<8x32xf32>
    %124 = vector.extract_strided_slice %104 {offsets = [0, 64], sizes = [8, 32], strides = [1, 1]} : vector<8x128xf32> to vector<8x32xf32>
    %125 = vector.extract_strided_slice %107 {offsets = [0, 64], sizes = [8, 32], strides = [1, 1]} : vector<8x128xf32> to vector<8x32xf32>
    %126 = arith.mulf %115, %125 : vector<8x32xf32>
    %127 = arith.addf %124, %126 : vector<8x32xf32>
    %128 = math.tanh %127 : vector<8x32xf32>
    %cst_36 = arith.constant 1.000000e+00 : f32
    %129 = vector.broadcast %cst_36 : f32 to vector<8x32xf32>
    %130 = arith.subf %129, %123 : vector<8x32xf32>
    %131 = arith.mulf %130, %128 : vector<8x32xf32>
    %132 = arith.mulf %123, %103 : vector<8x32xf32>
    %133 = arith.addf %131, %132 : vector<8x32xf32>
    %c32 = arith.constant 32 : index
    %c0_37 = arith.constant 0 : index
    %134 = vector.load %arg10[%c32, %c0_37] : memref<64x128xf32, #tpu.memory_space<vmem>>, vector<8x128xf32>
    %cst_38 = arith.constant dense<0.000000e+00> : vector<8x128xf32>
    %135 = tpu.matmul %133, %10, %cst_38 {dimension_numbers = #tpu.dot_dimension_numbers<[1], [0], [0], [1], [0, 0, 1, 1], [], []>} : vector<8x32xf32>, vector<32x128xf32>, vector<8x128xf32> -> vector<8x128xf32>
    %136 = vector.broadcast %12 : vector<1x128xf32> to vector<8x128xf32>
    %137 = arith.addf %135, %136 : vector<8x128xf32>
    %138 = vector.extract_strided_slice %134 {offsets = [0, 0], sizes = [8, 32], strides = [1, 1]} : vector<8x128xf32> to vector<8x32xf32>
    %139 = vector.extract_strided_slice %137 {offsets = [0, 0], sizes = [8, 32], strides = [1, 1]} : vector<8x128xf32> to vector<8x32xf32>
    %140 = arith.addf %138, %139 : vector<8x32xf32>
    %141 = arith.negf %140 : vector<8x32xf32>
    %142 = math.exp %141 : vector<8x32xf32>
    %cst_39 = arith.constant 1.000000e+00 : f32
    %143 = vector.broadcast %cst_39 : f32 to vector<8x32xf32>
    %144 = arith.addf %143, %142 : vector<8x32xf32>
    %145 = arith.divf %143, %144 : vector<8x32xf32>
    %146 = vector.extract_strided_slice %134 {offsets = [0, 32], sizes = [8, 32], strides = [1, 1]} : vector<8x128xf32> to vector<8x32xf32>
    %147 = vector.extract_strided_slice %137 {offsets = [0, 32], sizes = [8, 32], strides = [1, 1]} : vector<8x128xf32> to vector<8x32xf32>
    %148 = arith.addf %146, %147 : vector<8x32xf32>
    %149 = arith.negf %148 : vector<8x32xf32>
    %150 = math.exp %149 : vector<8x32xf32>
    %cst_40 = arith.constant 1.000000e+00 : f32
    %151 = vector.broadcast %cst_40 : f32 to vector<8x32xf32>
    %152 = arith.addf %151, %150 : vector<8x32xf32>
    %153 = arith.divf %151, %152 : vector<8x32xf32>
    %154 = vector.extract_strided_slice %134 {offsets = [0, 64], sizes = [8, 32], strides = [1, 1]} : vector<8x128xf32> to vector<8x32xf32>
    %155 = vector.extract_strided_slice %137 {offsets = [0, 64], sizes = [8, 32], strides = [1, 1]} : vector<8x128xf32> to vector<8x32xf32>
    %156 = arith.mulf %145, %155 : vector<8x32xf32>
    %157 = arith.addf %154, %156 : vector<8x32xf32>
    %158 = math.tanh %157 : vector<8x32xf32>
    %cst_41 = arith.constant 1.000000e+00 : f32
    %159 = vector.broadcast %cst_41 : f32 to vector<8x32xf32>
    %160 = arith.subf %159, %153 : vector<8x32xf32>
    %161 = arith.mulf %160, %158 : vector<8x32xf32>
    %162 = arith.mulf %153, %133 : vector<8x32xf32>
    %163 = arith.addf %161, %162 : vector<8x32xf32>
    %c40 = arith.constant 40 : index
    %c0_42 = arith.constant 0 : index
    %164 = vector.load %arg10[%c40, %c0_42] : memref<64x128xf32, #tpu.memory_space<vmem>>, vector<8x128xf32>
    %cst_43 = arith.constant dense<0.000000e+00> : vector<8x128xf32>
    %165 = tpu.matmul %163, %10, %cst_43 {dimension_numbers = #tpu.dot_dimension_numbers<[1], [0], [0], [1], [0, 0, 1, 1], [], []>} : vector<8x32xf32>, vector<32x128xf32>, vector<8x128xf32> -> vector<8x128xf32>
    %166 = vector.broadcast %12 : vector<1x128xf32> to vector<8x128xf32>
    %167 = arith.addf %165, %166 : vector<8x128xf32>
    %168 = vector.extract_strided_slice %164 {offsets = [0, 0], sizes = [8, 32], strides = [1, 1]} : vector<8x128xf32> to vector<8x32xf32>
    %169 = vector.extract_strided_slice %167 {offsets = [0, 0], sizes = [8, 32], strides = [1, 1]} : vector<8x128xf32> to vector<8x32xf32>
    %170 = arith.addf %168, %169 : vector<8x32xf32>
    %171 = arith.negf %170 : vector<8x32xf32>
    %172 = math.exp %171 : vector<8x32xf32>
    %cst_44 = arith.constant 1.000000e+00 : f32
    %173 = vector.broadcast %cst_44 : f32 to vector<8x32xf32>
    %174 = arith.addf %173, %172 : vector<8x32xf32>
    %175 = arith.divf %173, %174 : vector<8x32xf32>
    %176 = vector.extract_strided_slice %164 {offsets = [0, 32], sizes = [8, 32], strides = [1, 1]} : vector<8x128xf32> to vector<8x32xf32>
    %177 = vector.extract_strided_slice %167 {offsets = [0, 32], sizes = [8, 32], strides = [1, 1]} : vector<8x128xf32> to vector<8x32xf32>
    %178 = arith.addf %176, %177 : vector<8x32xf32>
    %179 = arith.negf %178 : vector<8x32xf32>
    %180 = math.exp %179 : vector<8x32xf32>
    %cst_45 = arith.constant 1.000000e+00 : f32
    %181 = vector.broadcast %cst_45 : f32 to vector<8x32xf32>
    %182 = arith.addf %181, %180 : vector<8x32xf32>
    %183 = arith.divf %181, %182 : vector<8x32xf32>
    %184 = vector.extract_strided_slice %164 {offsets = [0, 64], sizes = [8, 32], strides = [1, 1]} : vector<8x128xf32> to vector<8x32xf32>
    %185 = vector.extract_strided_slice %167 {offsets = [0, 64], sizes = [8, 32], strides = [1, 1]} : vector<8x128xf32> to vector<8x32xf32>
    %186 = arith.mulf %175, %185 : vector<8x32xf32>
    %187 = arith.addf %184, %186 : vector<8x32xf32>
    %188 = math.tanh %187 : vector<8x32xf32>
    %cst_46 = arith.constant 1.000000e+00 : f32
    %189 = vector.broadcast %cst_46 : f32 to vector<8x32xf32>
    %190 = arith.subf %189, %183 : vector<8x32xf32>
    %191 = arith.mulf %190, %188 : vector<8x32xf32>
    %192 = arith.mulf %183, %163 : vector<8x32xf32>
    %193 = arith.addf %191, %192 : vector<8x32xf32>
    %c48 = arith.constant 48 : index
    %c0_47 = arith.constant 0 : index
    %194 = vector.load %arg10[%c48, %c0_47] : memref<64x128xf32, #tpu.memory_space<vmem>>, vector<8x128xf32>
    %cst_48 = arith.constant dense<0.000000e+00> : vector<8x128xf32>
    %195 = tpu.matmul %193, %10, %cst_48 {dimension_numbers = #tpu.dot_dimension_numbers<[1], [0], [0], [1], [0, 0, 1, 1], [], []>} : vector<8x32xf32>, vector<32x128xf32>, vector<8x128xf32> -> vector<8x128xf32>
    %196 = vector.broadcast %12 : vector<1x128xf32> to vector<8x128xf32>
    %197 = arith.addf %195, %196 : vector<8x128xf32>
    %198 = vector.extract_strided_slice %194 {offsets = [0, 0], sizes = [8, 32], strides = [1, 1]} : vector<8x128xf32> to vector<8x32xf32>
    %199 = vector.extract_strided_slice %197 {offsets = [0, 0], sizes = [8, 32], strides = [1, 1]} : vector<8x128xf32> to vector<8x32xf32>
    %200 = arith.addf %198, %199 : vector<8x32xf32>
    %201 = arith.negf %200 : vector<8x32xf32>
    %202 = math.exp %201 : vector<8x32xf32>
    %cst_49 = arith.constant 1.000000e+00 : f32
    %203 = vector.broadcast %cst_49 : f32 to vector<8x32xf32>
    %204 = arith.addf %203, %202 : vector<8x32xf32>
    %205 = arith.divf %203, %204 : vector<8x32xf32>
    %206 = vector.extract_strided_slice %194 {offsets = [0, 32], sizes = [8, 32], strides = [1, 1]} : vector<8x128xf32> to vector<8x32xf32>
    %207 = vector.extract_strided_slice %197 {offsets = [0, 32], sizes = [8, 32], strides = [1, 1]} : vector<8x128xf32> to vector<8x32xf32>
    %208 = arith.addf %206, %207 : vector<8x32xf32>
    %209 = arith.negf %208 : vector<8x32xf32>
    %210 = math.exp %209 : vector<8x32xf32>
    %cst_50 = arith.constant 1.000000e+00 : f32
    %211 = vector.broadcast %cst_50 : f32 to vector<8x32xf32>
    %212 = arith.addf %211, %210 : vector<8x32xf32>
    %213 = arith.divf %211, %212 : vector<8x32xf32>
    %214 = vector.extract_strided_slice %194 {offsets = [0, 64], sizes = [8, 32], strides = [1, 1]} : vector<8x128xf32> to vector<8x32xf32>
    %215 = vector.extract_strided_slice %197 {offsets = [0, 64], sizes = [8, 32], strides = [1, 1]} : vector<8x128xf32> to vector<8x32xf32>
    %216 = arith.mulf %205, %215 : vector<8x32xf32>
    %217 = arith.addf %214, %216 : vector<8x32xf32>
    %218 = math.tanh %217 : vector<8x32xf32>
    %cst_51 = arith.constant 1.000000e+00 : f32
    %219 = vector.broadcast %cst_51 : f32 to vector<8x32xf32>
    %220 = arith.subf %219, %213 : vector<8x32xf32>
    %221 = arith.mulf %220, %218 : vector<8x32xf32>
    %222 = arith.mulf %213, %193 : vector<8x32xf32>
    %223 = arith.addf %221, %222 : vector<8x32xf32>
    %c56 = arith.constant 56 : index
    %c0_52 = arith.constant 0 : index
    %224 = vector.load %arg10[%c56, %c0_52] : memref<64x128xf32, #tpu.memory_space<vmem>>, vector<8x128xf32>
    %cst_53 = arith.constant dense<0.000000e+00> : vector<8x128xf32>
    %225 = tpu.matmul %223, %10, %cst_53 {dimension_numbers = #tpu.dot_dimension_numbers<[1], [0], [0], [1], [0, 0, 1, 1], [], []>} : vector<8x32xf32>, vector<32x128xf32>, vector<8x128xf32> -> vector<8x128xf32>
    %226 = vector.broadcast %12 : vector<1x128xf32> to vector<8x128xf32>
    %227 = arith.addf %225, %226 : vector<8x128xf32>
    %228 = vector.extract_strided_slice %224 {offsets = [0, 0], sizes = [8, 32], strides = [1, 1]} : vector<8x128xf32> to vector<8x32xf32>
    %229 = vector.extract_strided_slice %227 {offsets = [0, 0], sizes = [8, 32], strides = [1, 1]} : vector<8x128xf32> to vector<8x32xf32>
    %230 = arith.addf %228, %229 : vector<8x32xf32>
    %231 = arith.negf %230 : vector<8x32xf32>
    %232 = math.exp %231 : vector<8x32xf32>
    %cst_54 = arith.constant 1.000000e+00 : f32
    %233 = vector.broadcast %cst_54 : f32 to vector<8x32xf32>
    %234 = arith.addf %233, %232 : vector<8x32xf32>
    %235 = arith.divf %233, %234 : vector<8x32xf32>
    %236 = vector.extract_strided_slice %224 {offsets = [0, 32], sizes = [8, 32], strides = [1, 1]} : vector<8x128xf32> to vector<8x32xf32>
    %237 = vector.extract_strided_slice %227 {offsets = [0, 32], sizes = [8, 32], strides = [1, 1]} : vector<8x128xf32> to vector<8x32xf32>
    %238 = arith.addf %236, %237 : vector<8x32xf32>
    %239 = arith.negf %238 : vector<8x32xf32>
    %240 = math.exp %239 : vector<8x32xf32>
    %cst_55 = arith.constant 1.000000e+00 : f32
    %241 = vector.broadcast %cst_55 : f32 to vector<8x32xf32>
    %242 = arith.addf %241, %240 : vector<8x32xf32>
    %243 = arith.divf %241, %242 : vector<8x32xf32>
    %244 = vector.extract_strided_slice %224 {offsets = [0, 64], sizes = [8, 32], strides = [1, 1]} : vector<8x128xf32> to vector<8x32xf32>
    %245 = vector.extract_strided_slice %227 {offsets = [0, 64], sizes = [8, 32], strides = [1, 1]} : vector<8x128xf32> to vector<8x32xf32>
    %246 = arith.mulf %235, %245 : vector<8x32xf32>
    %247 = arith.addf %244, %246 : vector<8x32xf32>
    %248 = math.tanh %247 : vector<8x32xf32>
    %cst_56 = arith.constant 1.000000e+00 : f32
    %249 = vector.broadcast %cst_56 : f32 to vector<8x32xf32>
    %250 = arith.subf %249, %243 : vector<8x32xf32>
    %251 = arith.mulf %250, %248 : vector<8x32xf32>
    %252 = arith.mulf %243, %223 : vector<8x32xf32>
    %253 = arith.addf %251, %252 : vector<8x32xf32>
    %c1 = arith.constant 1 : index
    %c0_57 = arith.constant 0 : index
    %c0_58 = arith.constant 0 : index
    %254 = vector.load %arg1[%c1, %c0_57, %c0_58] : memref<2x32x128xf32, #tpu.memory_space<vmem>>, vector<1x32x128xf32>
    %255 = vector.shape_cast %254 : vector<1x32x128xf32> to vector<32x128xf32>
    %c1_59 = arith.constant 1 : index
    %c0_60 = arith.constant 0 : index
    %c0_61 = arith.constant 0 : index
    %256 = vector.load %arg3[%c1_59, %c0_60, %c0_61] : memref<2x1x128xf32, #tpu.memory_space<vmem>>, vector<1x1x128xf32>
    %257 = vector.shape_cast %256 : vector<1x1x128xf32> to vector<1x128xf32>
    %c1_62 = arith.constant 1 : index
    %c0_63 = arith.constant 0 : index
    %c0_64 = arith.constant 0 : index
    %258 = vector.load %arg2[%c1_62, %c0_63, %c0_64] : memref<2x32x128xf32, #tpu.memory_space<vmem>>, vector<1x32x128xf32>
    %259 = vector.shape_cast %258 : vector<1x32x128xf32> to vector<32x128xf32>
    %c1_65 = arith.constant 1 : index
    %c0_66 = arith.constant 0 : index
    %c0_67 = arith.constant 0 : index
    %260 = vector.load %arg4[%c1_65, %c0_66, %c0_67] : memref<2x1x128xf32, #tpu.memory_space<vmem>>, vector<1x1x128xf32>
    %261 = vector.shape_cast %260 : vector<1x1x128xf32> to vector<1x128xf32>
    %cst_68 = arith.constant 0.000000e+00 : f32
    %262 = vector.broadcast %cst_68 : f32 to vector<8x32xf32>
    %cst_69 = arith.constant dense<0.000000e+00> : vector<8x128xf32>
    %263 = tpu.matmul %43, %255, %cst_69 {dimension_numbers = #tpu.dot_dimension_numbers<[1], [0], [0], [1], [0, 0, 1, 1], [], []>} : vector<8x32xf32>, vector<32x128xf32>, vector<8x128xf32> -> vector<8x128xf32>
    %264 = vector.broadcast %257 : vector<1x128xf32> to vector<8x128xf32>
    %265 = arith.addf %263, %264 : vector<8x128xf32>
    %cst_70 = arith.constant dense<0.000000e+00> : vector<8x128xf32>
    %266 = tpu.matmul %262, %259, %cst_70 {dimension_numbers = #tpu.dot_dimension_numbers<[1], [0], [0], [1], [0, 0, 1, 1], [], []>} : vector<8x32xf32>, vector<32x128xf32>, vector<8x128xf32> -> vector<8x128xf32>
    %267 = vector.broadcast %261 : vector<1x128xf32> to vector<8x128xf32>
    %268 = arith.addf %266, %267 : vector<8x128xf32>
    %269 = vector.extract_strided_slice %265 {offsets = [0, 0], sizes = [8, 32], strides = [1, 1]} : vector<8x128xf32> to vector<8x32xf32>
    %270 = vector.extract_strided_slice %268 {offsets = [0, 0], sizes = [8, 32], strides = [1, 1]} : vector<8x128xf32> to vector<8x32xf32>
    %271 = arith.addf %269, %270 : vector<8x32xf32>
    %272 = arith.negf %271 : vector<8x32xf32>
    %273 = math.exp %272 : vector<8x32xf32>
    %cst_71 = arith.constant 1.000000e+00 : f32
    %274 = vector.broadcast %cst_71 : f32 to vector<8x32xf32>
    %275 = arith.addf %274, %273 : vector<8x32xf32>
    %276 = arith.divf %274, %275 : vector<8x32xf32>
    %277 = vector.extract_strided_slice %265 {offsets = [0, 32], sizes = [8, 32], strides = [1, 1]} : vector<8x128xf32> to vector<8x32xf32>
    %278 = vector.extract_strided_slice %268 {offsets = [0, 32], sizes = [8, 32], strides = [1, 1]} : vector<8x128xf32> to vector<8x32xf32>
    %279 = arith.addf %277, %278 : vector<8x32xf32>
    %280 = arith.negf %279 : vector<8x32xf32>
    %281 = math.exp %280 : vector<8x32xf32>
    %cst_72 = arith.constant 1.000000e+00 : f32
    %282 = vector.broadcast %cst_72 : f32 to vector<8x32xf32>
    %283 = arith.addf %282, %281 : vector<8x32xf32>
    %284 = arith.divf %282, %283 : vector<8x32xf32>
    %285 = vector.extract_strided_slice %265 {offsets = [0, 64], sizes = [8, 32], strides = [1, 1]} : vector<8x128xf32> to vector<8x32xf32>
    %286 = vector.extract_strided_slice %268 {offsets = [0, 64], sizes = [8, 32], strides = [1, 1]} : vector<8x128xf32> to vector<8x32xf32>
    %287 = arith.mulf %276, %286 : vector<8x32xf32>
    %288 = arith.addf %285, %287 : vector<8x32xf32>
    %289 = math.tanh %288 : vector<8x32xf32>
    %cst_73 = arith.constant 1.000000e+00 : f32
    %290 = vector.broadcast %cst_73 : f32 to vector<8x32xf32>
    %291 = arith.subf %290, %284 : vector<8x32xf32>
    %292 = arith.mulf %291, %289 : vector<8x32xf32>
    %293 = arith.mulf %284, %262 : vector<8x32xf32>
    %294 = arith.addf %292, %293 : vector<8x32xf32>
    %c0_74 = arith.constant 0 : index
    %c0_75 = arith.constant 0 : index
    %295 = vector.load %arg11[%c0_74, %c0_75] : memref<64x32xf32, #tpu.memory_space<vmem>>, vector<8x32xf32>
    tpu.vector_store %arg11[%c0_74, %c0_75], %294 {strides = array<i32>} : memref<64x32xf32, #tpu.memory_space<vmem>>, vector<8x32xf32>,
    %cst_76 = arith.constant dense<0.000000e+00> : vector<8x128xf32>
    %296 = tpu.matmul %73, %255, %cst_76 {dimension_numbers = #tpu.dot_dimension_numbers<[1], [0], [0], [1], [0, 0, 1, 1], [], []>} : vector<8x32xf32>, vector<32x128xf32>, vector<8x128xf32> -> vector<8x128xf32>
    %297 = vector.broadcast %257 : vector<1x128xf32> to vector<8x128xf32>
    %298 = arith.addf %296, %297 : vector<8x128xf32>
    %cst_77 = arith.constant dense<0.000000e+00> : vector<8x128xf32>
    %299 = tpu.matmul %294, %259, %cst_77 {dimension_numbers = #tpu.dot_dimension_numbers<[1], [0], [0], [1], [0, 0, 1, 1], [], []>} : vector<8x32xf32>, vector<32x128xf32>, vector<8x128xf32> -> vector<8x128xf32>
    %300 = vector.broadcast %261 : vector<1x128xf32> to vector<8x128xf32>
    %301 = arith.addf %299, %300 : vector<8x128xf32>
    %302 = vector.extract_strided_slice %298 {offsets = [0, 0], sizes = [8, 32], strides = [1, 1]} : vector<8x128xf32> to vector<8x32xf32>
    %303 = vector.extract_strided_slice %301 {offsets = [0, 0], sizes = [8, 32], strides = [1, 1]} : vector<8x128xf32> to vector<8x32xf32>
    %304 = arith.addf %302, %303 : vector<8x32xf32>
    %305 = arith.negf %304 : vector<8x32xf32>
    %306 = math.exp %305 : vector<8x32xf32>
    %cst_78 = arith.constant 1.000000e+00 : f32
    %307 = vector.broadcast %cst_78 : f32 to vector<8x32xf32>
    %308 = arith.addf %307, %306 : vector<8x32xf32>
    %309 = arith.divf %307, %308 : vector<8x32xf32>
    %310 = vector.extract_strided_slice %298 {offsets = [0, 32], sizes = [8, 32], strides = [1, 1]} : vector<8x128xf32> to vector<8x32xf32>
    %311 = vector.extract_strided_slice %301 {offsets = [0, 32], sizes = [8, 32], strides = [1, 1]} : vector<8x128xf32> to vector<8x32xf32>
    %312 = arith.addf %310, %311 : vector<8x32xf32>
    %313 = arith.negf %312 : vector<8x32xf32>
    %314 = math.exp %313 : vector<8x32xf32>
    %cst_79 = arith.constant 1.000000e+00 : f32
    %315 = vector.broadcast %cst_79 : f32 to vector<8x32xf32>
    %316 = arith.addf %315, %314 : vector<8x32xf32>
    %317 = arith.divf %315, %316 : vector<8x32xf32>
    %318 = vector.extract_strided_slice %298 {offsets = [0, 64], sizes = [8, 32], strides = [1, 1]} : vector<8x128xf32> to vector<8x32xf32>
    %319 = vector.extract_strided_slice %301 {offsets = [0, 64], sizes = [8, 32], strides = [1, 1]} : vector<8x128xf32> to vector<8x32xf32>
    %320 = arith.mulf %309, %319 : vector<8x32xf32>
    %321 = arith.addf %318, %320 : vector<8x32xf32>
    %322 = math.tanh %321 : vector<8x32xf32>
    %cst_80 = arith.constant 1.000000e+00 : f32
    %323 = vector.broadcast %cst_80 : f32 to vector<8x32xf32>
    %324 = arith.subf %323, %317 : vector<8x32xf32>
    %325 = arith.mulf %324, %322 : vector<8x32xf32>
    %326 = arith.mulf %317, %294 : vector<8x32xf32>
    %327 = arith.addf %325, %326 : vector<8x32xf32>
    %c8_81 = arith.constant 8 : index
    %c0_82 = arith.constant 0 : index
    %328 = vector.load %arg11[%c8_81, %c0_82] : memref<64x32xf32, #tpu.memory_space<vmem>>, vector<8x32xf32>
    tpu.vector_store %arg11[%c8_81, %c0_82], %327 {strides = array<i32>} : memref<64x32xf32, #tpu.memory_space<vmem>>, vector<8x32xf32>,
    %cst_83 = arith.constant dense<0.000000e+00> : vector<8x128xf32>
    %329 = tpu.matmul %103, %255, %cst_83 {dimension_numbers = #tpu.dot_dimension_numbers<[1], [0], [0], [1], [0, 0, 1, 1], [], []>} : vector<8x32xf32>, vector<32x128xf32>, vector<8x128xf32> -> vector<8x128xf32>
    %330 = vector.broadcast %257 : vector<1x128xf32> to vector<8x128xf32>
    %331 = arith.addf %329, %330 : vector<8x128xf32>
    %cst_84 = arith.constant dense<0.000000e+00> : vector<8x128xf32>
    %332 = tpu.matmul %327, %259, %cst_84 {dimension_numbers = #tpu.dot_dimension_numbers<[1], [0], [0], [1], [0, 0, 1, 1], [], []>} : vector<8x32xf32>, vector<32x128xf32>, vector<8x128xf32> -> vector<8x128xf32>
    %333 = vector.broadcast %261 : vector<1x128xf32> to vector<8x128xf32>
    %334 = arith.addf %332, %333 : vector<8x128xf32>
    %335 = vector.extract_strided_slice %331 {offsets = [0, 0], sizes = [8, 32], strides = [1, 1]} : vector<8x128xf32> to vector<8x32xf32>
    %336 = vector.extract_strided_slice %334 {offsets = [0, 0], sizes = [8, 32], strides = [1, 1]} : vector<8x128xf32> to vector<8x32xf32>
    %337 = arith.addf %335, %336 : vector<8x32xf32>
    %338 = arith.negf %337 : vector<8x32xf32>
    %339 = math.exp %338 : vector<8x32xf32>
    %cst_85 = arith.constant 1.000000e+00 : f32
    %340 = vector.broadcast %cst_85 : f32 to vector<8x32xf32>
    %341 = arith.addf %340, %339 : vector<8x32xf32>
    %342 = arith.divf %340, %341 : vector<8x32xf32>
    %343 = vector.extract_strided_slice %331 {offsets = [0, 32], sizes = [8, 32], strides = [1, 1]} : vector<8x128xf32> to vector<8x32xf32>
    %344 = vector.extract_strided_slice %334 {offsets = [0, 32], sizes = [8, 32], strides = [1, 1]} : vector<8x128xf32> to vector<8x32xf32>
    %345 = arith.addf %343, %344 : vector<8x32xf32>
    %346 = arith.negf %345 : vector<8x32xf32>
    %347 = math.exp %346 : vector<8x32xf32>
    %cst_86 = arith.constant 1.000000e+00 : f32
    %348 = vector.broadcast %cst_86 : f32 to vector<8x32xf32>
    %349 = arith.addf %348, %347 : vector<8x32xf32>
    %350 = arith.divf %348, %349 : vector<8x32xf32>
    %351 = vector.extract_strided_slice %331 {offsets = [0, 64], sizes = [8, 32], strides = [1, 1]} : vector<8x128xf32> to vector<8x32xf32>
    %352 = vector.extract_strided_slice %334 {offsets = [0, 64], sizes = [8, 32], strides = [1, 1]} : vector<8x128xf32> to vector<8x32xf32>
    %353 = arith.mulf %342, %352 : vector<8x32xf32>
    %354 = arith.addf %351, %353 : vector<8x32xf32>
    %355 = math.tanh %354 : vector<8x32xf32>
    %cst_87 = arith.constant 1.000000e+00 : f32
    %356 = vector.broadcast %cst_87 : f32 to vector<8x32xf32>
    %357 = arith.subf %356, %350 : vector<8x32xf32>
    %358 = arith.mulf %357, %355 : vector<8x32xf32>
    %359 = arith.mulf %350, %327 : vector<8x32xf32>
    %360 = arith.addf %358, %359 : vector<8x32xf32>
    %c16_88 = arith.constant 16 : index
    %c0_89 = arith.constant 0 : index
    %361 = vector.load %arg11[%c16_88, %c0_89] : memref<64x32xf32, #tpu.memory_space<vmem>>, vector<8x32xf32>
    tpu.vector_store %arg11[%c16_88, %c0_89], %360 {strides = array<i32>} : memref<64x32xf32, #tpu.memory_space<vmem>>, vector<8x32xf32>,
    %cst_90 = arith.constant dense<0.000000e+00> : vector<8x128xf32>
    %362 = tpu.matmul %133, %255, %cst_90 {dimension_numbers = #tpu.dot_dimension_numbers<[1], [0], [0], [1], [0, 0, 1, 1], [], []>} : vector<8x32xf32>, vector<32x128xf32>, vector<8x128xf32> -> vector<8x128xf32>
    %363 = vector.broadcast %257 : vector<1x128xf32> to vector<8x128xf32>
    %364 = arith.addf %362, %363 : vector<8x128xf32>
    %cst_91 = arith.constant dense<0.000000e+00> : vector<8x128xf32>
    %365 = tpu.matmul %360, %259, %cst_91 {dimension_numbers = #tpu.dot_dimension_numbers<[1], [0], [0], [1], [0, 0, 1, 1], [], []>} : vector<8x32xf32>, vector<32x128xf32>, vector<8x128xf32> -> vector<8x128xf32>
    %366 = vector.broadcast %261 : vector<1x128xf32> to vector<8x128xf32>
    %367 = arith.addf %365, %366 : vector<8x128xf32>
    %368 = vector.extract_strided_slice %364 {offsets = [0, 0], sizes = [8, 32], strides = [1, 1]} : vector<8x128xf32> to vector<8x32xf32>
    %369 = vector.extract_strided_slice %367 {offsets = [0, 0], sizes = [8, 32], strides = [1, 1]} : vector<8x128xf32> to vector<8x32xf32>
    %370 = arith.addf %368, %369 : vector<8x32xf32>
    %371 = arith.negf %370 : vector<8x32xf32>
    %372 = math.exp %371 : vector<8x32xf32>
    %cst_92 = arith.constant 1.000000e+00 : f32
    %373 = vector.broadcast %cst_92 : f32 to vector<8x32xf32>
    %374 = arith.addf %373, %372 : vector<8x32xf32>
    %375 = arith.divf %373, %374 : vector<8x32xf32>
    %376 = vector.extract_strided_slice %364 {offsets = [0, 32], sizes = [8, 32], strides = [1, 1]} : vector<8x128xf32> to vector<8x32xf32>
    %377 = vector.extract_strided_slice %367 {offsets = [0, 32], sizes = [8, 32], strides = [1, 1]} : vector<8x128xf32> to vector<8x32xf32>
    %378 = arith.addf %376, %377 : vector<8x32xf32>
    %379 = arith.negf %378 : vector<8x32xf32>
    %380 = math.exp %379 : vector<8x32xf32>
    %cst_93 = arith.constant 1.000000e+00 : f32
    %381 = vector.broadcast %cst_93 : f32 to vector<8x32xf32>
    %382 = arith.addf %381, %380 : vector<8x32xf32>
    %383 = arith.divf %381, %382 : vector<8x32xf32>
    %384 = vector.extract_strided_slice %364 {offsets = [0, 64], sizes = [8, 32], strides = [1, 1]} : vector<8x128xf32> to vector<8x32xf32>
    %385 = vector.extract_strided_slice %367 {offsets = [0, 64], sizes = [8, 32], strides = [1, 1]} : vector<8x128xf32> to vector<8x32xf32>
    %386 = arith.mulf %375, %385 : vector<8x32xf32>
    %387 = arith.addf %384, %386 : vector<8x32xf32>
    %388 = math.tanh %387 : vector<8x32xf32>
    %cst_94 = arith.constant 1.000000e+00 : f32
    %389 = vector.broadcast %cst_94 : f32 to vector<8x32xf32>
    %390 = arith.subf %389, %383 : vector<8x32xf32>
    %391 = arith.mulf %390, %388 : vector<8x32xf32>
    %392 = arith.mulf %383, %360 : vector<8x32xf32>
    %393 = arith.addf %391, %392 : vector<8x32xf32>
    %c24_95 = arith.constant 24 : index
    %c0_96 = arith.constant 0 : index
    %394 = vector.load %arg11[%c24_95, %c0_96] : memref<64x32xf32, #tpu.memory_space<vmem>>, vector<8x32xf32>
    tpu.vector_store %arg11[%c24_95, %c0_96], %393 {strides = array<i32>} : memref<64x32xf32, #tpu.memory_space<vmem>>, vector<8x32xf32>,
    %cst_97 = arith.constant dense<0.000000e+00> : vector<8x128xf32>
    %395 = tpu.matmul %163, %255, %cst_97 {dimension_numbers = #tpu.dot_dimension_numbers<[1], [0], [0], [1], [0, 0, 1, 1], [], []>} : vector<8x32xf32>, vector<32x128xf32>, vector<8x128xf32> -> vector<8x128xf32>
    %396 = vector.broadcast %257 : vector<1x128xf32> to vector<8x128xf32>
    %397 = arith.addf %395, %396 : vector<8x128xf32>
    %cst_98 = arith.constant dense<0.000000e+00> : vector<8x128xf32>
    %398 = tpu.matmul %393, %259, %cst_98 {dimension_numbers = #tpu.dot_dimension_numbers<[1], [0], [0], [1], [0, 0, 1, 1], [], []>} : vector<8x32xf32>, vector<32x128xf32>, vector<8x128xf32> -> vector<8x128xf32>
    %399 = vector.broadcast %261 : vector<1x128xf32> to vector<8x128xf32>
    %400 = arith.addf %398, %399 : vector<8x128xf32>
    %401 = vector.extract_strided_slice %397 {offsets = [0, 0], sizes = [8, 32], strides = [1, 1]} : vector<8x128xf32> to vector<8x32xf32>
    %402 = vector.extract_strided_slice %400 {offsets = [0, 0], sizes = [8, 32], strides = [1, 1]} : vector<8x128xf32> to vector<8x32xf32>
    %403 = arith.addf %401, %402 : vector<8x32xf32>
    %404 = arith.negf %403 : vector<8x32xf32>
    %405 = math.exp %404 : vector<8x32xf32>
    %cst_99 = arith.constant 1.000000e+00 : f32
    %406 = vector.broadcast %cst_99 : f32 to vector<8x32xf32>
    %407 = arith.addf %406, %405 : vector<8x32xf32>
    %408 = arith.divf %406, %407 : vector<8x32xf32>
    %409 = vector.extract_strided_slice %397 {offsets = [0, 32], sizes = [8, 32], strides = [1, 1]} : vector<8x128xf32> to vector<8x32xf32>
    %410 = vector.extract_strided_slice %400 {offsets = [0, 32], sizes = [8, 32], strides = [1, 1]} : vector<8x128xf32> to vector<8x32xf32>
    %411 = arith.addf %409, %410 : vector<8x32xf32>
    %412 = arith.negf %411 : vector<8x32xf32>
    %413 = math.exp %412 : vector<8x32xf32>
    %cst_100 = arith.constant 1.000000e+00 : f32
    %414 = vector.broadcast %cst_100 : f32 to vector<8x32xf32>
    %415 = arith.addf %414, %413 : vector<8x32xf32>
    %416 = arith.divf %414, %415 : vector<8x32xf32>
    %417 = vector.extract_strided_slice %397 {offsets = [0, 64], sizes = [8, 32], strides = [1, 1]} : vector<8x128xf32> to vector<8x32xf32>
    %418 = vector.extract_strided_slice %400 {offsets = [0, 64], sizes = [8, 32], strides = [1, 1]} : vector<8x128xf32> to vector<8x32xf32>
    %419 = arith.mulf %408, %418 : vector<8x32xf32>
    %420 = arith.addf %417, %419 : vector<8x32xf32>
    %421 = math.tanh %420 : vector<8x32xf32>
    %cst_101 = arith.constant 1.000000e+00 : f32
    %422 = vector.broadcast %cst_101 : f32 to vector<8x32xf32>
    %423 = arith.subf %422, %416 : vector<8x32xf32>
    %424 = arith.mulf %423, %421 : vector<8x32xf32>
    %425 = arith.mulf %416, %393 : vector<8x32xf32>
    %426 = arith.addf %424, %425 : vector<8x32xf32>
    %c32_102 = arith.constant 32 : index
    %c0_103 = arith.constant 0 : index
    %427 = vector.load %arg11[%c32_102, %c0_103] : memref<64x32xf32, #tpu.memory_space<vmem>>, vector<8x32xf32>
    tpu.vector_store %arg11[%c32_102, %c0_103], %426 {strides = array<i32>} : memref<64x32xf32, #tpu.memory_space<vmem>>, vector<8x32xf32>,
    %cst_104 = arith.constant dense<0.000000e+00> : vector<8x128xf32>
    %428 = tpu.matmul %193, %255, %cst_104 {dimension_numbers = #tpu.dot_dimension_numbers<[1], [0], [0], [1], [0, 0, 1, 1], [], []>} : vector<8x32xf32>, vector<32x128xf32>, vector<8x128xf32> -> vector<8x128xf32>
    %429 = vector.broadcast %257 : vector<1x128xf32> to vector<8x128xf32>
    %430 = arith.addf %428, %429 : vector<8x128xf32>
    %cst_105 = arith.constant dense<0.000000e+00> : vector<8x128xf32>
    %431 = tpu.matmul %426, %259, %cst_105 {dimension_numbers = #tpu.dot_dimension_numbers<[1], [0], [0], [1], [0, 0, 1, 1], [], []>} : vector<8x32xf32>, vector<32x128xf32>, vector<8x128xf32> -> vector<8x128xf32>
    %432 = vector.broadcast %261 : vector<1x128xf32> to vector<8x128xf32>
    %433 = arith.addf %431, %432 : vector<8x128xf32>
    %434 = vector.extract_strided_slice %430 {offsets = [0, 0], sizes = [8, 32], strides = [1, 1]} : vector<8x128xf32> to vector<8x32xf32>
    %435 = vector.extract_strided_slice %433 {offsets = [0, 0], sizes = [8, 32], strides = [1, 1]} : vector<8x128xf32> to vector<8x32xf32>
    %436 = arith.addf %434, %435 : vector<8x32xf32>
    %437 = arith.negf %436 : vector<8x32xf32>
    %438 = math.exp %437 : vector<8x32xf32>
    %cst_106 = arith.constant 1.000000e+00 : f32
    %439 = vector.broadcast %cst_106 : f32 to vector<8x32xf32>
    %440 = arith.addf %439, %438 : vector<8x32xf32>
    %441 = arith.divf %439, %440 : vector<8x32xf32>
    %442 = vector.extract_strided_slice %430 {offsets = [0, 32], sizes = [8, 32], strides = [1, 1]} : vector<8x128xf32> to vector<8x32xf32>
    %443 = vector.extract_strided_slice %433 {offsets = [0, 32], sizes = [8, 32], strides = [1, 1]} : vector<8x128xf32> to vector<8x32xf32>
    %444 = arith.addf %442, %443 : vector<8x32xf32>
    %445 = arith.negf %444 : vector<8x32xf32>
    %446 = math.exp %445 : vector<8x32xf32>
    %cst_107 = arith.constant 1.000000e+00 : f32
    %447 = vector.broadcast %cst_107 : f32 to vector<8x32xf32>
    %448 = arith.addf %447, %446 : vector<8x32xf32>
    %449 = arith.divf %447, %448 : vector<8x32xf32>
    %450 = vector.extract_strided_slice %430 {offsets = [0, 64], sizes = [8, 32], strides = [1, 1]} : vector<8x128xf32> to vector<8x32xf32>
    %451 = vector.extract_strided_slice %433 {offsets = [0, 64], sizes = [8, 32], strides = [1, 1]} : vector<8x128xf32> to vector<8x32xf32>
    %452 = arith.mulf %441, %451 : vector<8x32xf32>
    %453 = arith.addf %450, %452 : vector<8x32xf32>
    %454 = math.tanh %453 : vector<8x32xf32>
    %cst_108 = arith.constant 1.000000e+00 : f32
    %455 = vector.broadcast %cst_108 : f32 to vector<8x32xf32>
    %456 = arith.subf %455, %449 : vector<8x32xf32>
    %457 = arith.mulf %456, %454 : vector<8x32xf32>
    %458 = arith.mulf %449, %426 : vector<8x32xf32>
    %459 = arith.addf %457, %458 : vector<8x32xf32>
    %c40_109 = arith.constant 40 : index
    %c0_110 = arith.constant 0 : index
    %460 = vector.load %arg11[%c40_109, %c0_110] : memref<64x32xf32, #tpu.memory_space<vmem>>, vector<8x32xf32>
    tpu.vector_store %arg11[%c40_109, %c0_110], %459 {strides = array<i32>} : memref<64x32xf32, #tpu.memory_space<vmem>>, vector<8x32xf32>,
    %cst_111 = arith.constant dense<0.000000e+00> : vector<8x128xf32>
    %461 = tpu.matmul %223, %255, %cst_111 {dimension_numbers = #tpu.dot_dimension_numbers<[1], [0], [0], [1], [0, 0, 1, 1], [], []>} : vector<8x32xf32>, vector<32x128xf32>, vector<8x128xf32> -> vector<8x128xf32>
    %462 = vector.broadcast %257 : vector<1x128xf32> to vector<8x128xf32>
    %463 = arith.addf %461, %462 : vector<8x128xf32>
    %cst_112 = arith.constant dense<0.000000e+00> : vector<8x128xf32>
    %464 = tpu.matmul %459, %259, %cst_112 {dimension_numbers = #tpu.dot_dimension_numbers<[1], [0], [0], [1], [0, 0, 1, 1], [], []>} : vector<8x32xf32>, vector<32x128xf32>, vector<8x128xf32> -> vector<8x128xf32>
    %465 = vector.broadcast %261 : vector<1x128xf32> to vector<8x128xf32>
    %466 = arith.addf %464, %465 : vector<8x128xf32>
    %467 = vector.extract_strided_slice %463 {offsets = [0, 0], sizes = [8, 32], strides = [1, 1]} : vector<8x128xf32> to vector<8x32xf32>
    %468 = vector.extract_strided_slice %466 {offsets = [0, 0], sizes = [8, 32], strides = [1, 1]} : vector<8x128xf32> to vector<8x32xf32>
    %469 = arith.addf %467, %468 : vector<8x32xf32>
    %470 = arith.negf %469 : vector<8x32xf32>
    %471 = math.exp %470 : vector<8x32xf32>
    %cst_113 = arith.constant 1.000000e+00 : f32
    %472 = vector.broadcast %cst_113 : f32 to vector<8x32xf32>
    %473 = arith.addf %472, %471 : vector<8x32xf32>
    %474 = arith.divf %472, %473 : vector<8x32xf32>
    %475 = vector.extract_strided_slice %463 {offsets = [0, 32], sizes = [8, 32], strides = [1, 1]} : vector<8x128xf32> to vector<8x32xf32>
    %476 = vector.extract_strided_slice %466 {offsets = [0, 32], sizes = [8, 32], strides = [1, 1]} : vector<8x128xf32> to vector<8x32xf32>
    %477 = arith.addf %475, %476 : vector<8x32xf32>
    %478 = arith.negf %477 : vector<8x32xf32>
    %479 = math.exp %478 : vector<8x32xf32>
    %cst_114 = arith.constant 1.000000e+00 : f32
    %480 = vector.broadcast %cst_114 : f32 to vector<8x32xf32>
    %481 = arith.addf %480, %479 : vector<8x32xf32>
    %482 = arith.divf %480, %481 : vector<8x32xf32>
    %483 = vector.extract_strided_slice %463 {offsets = [0, 64], sizes = [8, 32], strides = [1, 1]} : vector<8x128xf32> to vector<8x32xf32>
    %484 = vector.extract_strided_slice %466 {offsets = [0, 64], sizes = [8, 32], strides = [1, 1]} : vector<8x128xf32> to vector<8x32xf32>
    %485 = arith.mulf %474, %484 : vector<8x32xf32>
    %486 = arith.addf %483, %485 : vector<8x32xf32>
    %487 = math.tanh %486 : vector<8x32xf32>
    %cst_115 = arith.constant 1.000000e+00 : f32
    %488 = vector.broadcast %cst_115 : f32 to vector<8x32xf32>
    %489 = arith.subf %488, %482 : vector<8x32xf32>
    %490 = arith.mulf %489, %487 : vector<8x32xf32>
    %491 = arith.mulf %482, %459 : vector<8x32xf32>
    %492 = arith.addf %490, %491 : vector<8x32xf32>
    %c48_116 = arith.constant 48 : index
    %c0_117 = arith.constant 0 : index
    %493 = vector.load %arg11[%c48_116, %c0_117] : memref<64x32xf32, #tpu.memory_space<vmem>>, vector<8x32xf32>
    tpu.vector_store %arg11[%c48_116, %c0_117], %492 {strides = array<i32>} : memref<64x32xf32, #tpu.memory_space<vmem>>, vector<8x32xf32>,
    %cst_118 = arith.constant dense<0.000000e+00> : vector<8x128xf32>
    %494 = tpu.matmul %253, %255, %cst_118 {dimension_numbers = #tpu.dot_dimension_numbers<[1], [0], [0], [1], [0, 0, 1, 1], [], []>} : vector<8x32xf32>, vector<32x128xf32>, vector<8x128xf32> -> vector<8x128xf32>
    %495 = vector.broadcast %257 : vector<1x128xf32> to vector<8x128xf32>
    %496 = arith.addf %494, %495 : vector<8x128xf32>
    %cst_119 = arith.constant dense<0.000000e+00> : vector<8x128xf32>
    %497 = tpu.matmul %492, %259, %cst_119 {dimension_numbers = #tpu.dot_dimension_numbers<[1], [0], [0], [1], [0, 0, 1, 1], [], []>} : vector<8x32xf32>, vector<32x128xf32>, vector<8x128xf32> -> vector<8x128xf32>
    %498 = vector.broadcast %261 : vector<1x128xf32> to vector<8x128xf32>
    %499 = arith.addf %497, %498 : vector<8x128xf32>
    %500 = vector.extract_strided_slice %496 {offsets = [0, 0], sizes = [8, 32], strides = [1, 1]} : vector<8x128xf32> to vector<8x32xf32>
    %501 = vector.extract_strided_slice %499 {offsets = [0, 0], sizes = [8, 32], strides = [1, 1]} : vector<8x128xf32> to vector<8x32xf32>
    %502 = arith.addf %500, %501 : vector<8x32xf32>
    %503 = arith.negf %502 : vector<8x32xf32>
    %504 = math.exp %503 : vector<8x32xf32>
    %cst_120 = arith.constant 1.000000e+00 : f32
    %505 = vector.broadcast %cst_120 : f32 to vector<8x32xf32>
    %506 = arith.addf %505, %504 : vector<8x32xf32>
    %507 = arith.divf %505, %506 : vector<8x32xf32>
    %508 = vector.extract_strided_slice %496 {offsets = [0, 32], sizes = [8, 32], strides = [1, 1]} : vector<8x128xf32> to vector<8x32xf32>
    %509 = vector.extract_strided_slice %499 {offsets = [0, 32], sizes = [8, 32], strides = [1, 1]} : vector<8x128xf32> to vector<8x32xf32>
    %510 = arith.addf %508, %509 : vector<8x32xf32>
    %511 = arith.negf %510 : vector<8x32xf32>
    %512 = math.exp %511 : vector<8x32xf32>
    %cst_121 = arith.constant 1.000000e+00 : f32
    %513 = vector.broadcast %cst_121 : f32 to vector<8x32xf32>
    %514 = arith.addf %513, %512 : vector<8x32xf32>
    %515 = arith.divf %513, %514 : vector<8x32xf32>
    %516 = vector.extract_strided_slice %496 {offsets = [0, 64], sizes = [8, 32], strides = [1, 1]} : vector<8x128xf32> to vector<8x32xf32>
    %517 = vector.extract_strided_slice %499 {offsets = [0, 64], sizes = [8, 32], strides = [1, 1]} : vector<8x128xf32> to vector<8x32xf32>
    %518 = arith.mulf %507, %517 : vector<8x32xf32>
    %519 = arith.addf %516, %518 : vector<8x32xf32>
    %520 = math.tanh %519 : vector<8x32xf32>
    %cst_122 = arith.constant 1.000000e+00 : f32
    %521 = vector.broadcast %cst_122 : f32 to vector<8x32xf32>
    %522 = arith.subf %521, %515 : vector<8x32xf32>
    %523 = arith.mulf %522, %520 : vector<8x32xf32>
    %524 = arith.mulf %515, %492 : vector<8x32xf32>
    %525 = arith.addf %523, %524 : vector<8x32xf32>
    %c56_123 = arith.constant 56 : index
    %c0_124 = arith.constant 0 : index
    %526 = vector.load %arg11[%c56_123, %c0_124] : memref<64x32xf32, #tpu.memory_space<vmem>>, vector<8x32xf32>
    tpu.vector_store %arg11[%c56_123, %c0_124], %525 {strides = array<i32>} : memref<64x32xf32, #tpu.memory_space<vmem>>, vector<8x32xf32>,
    %c0_125 = arith.constant 0 : index
    %c0_126 = arith.constant 0 : index
    %527 = vector.load %arg11[%c0_125, %c0_126] : memref<64x32xf32, #tpu.memory_space<vmem>>, vector<64x32xf32>
    %c0_127 = arith.constant 0 : index
    %c0_128 = arith.constant 0 : index
    %528 = vector.load %arg5[%c0_127, %c0_128] : memref<32x128xf32, #tpu.memory_space<vmem>>, vector<32x128xf32>
    %cst_129 = arith.constant dense<0.000000e+00> : vector<64x128xf32>
    %529 = tpu.matmul %527, %528, %cst_129 {dimension_numbers = #tpu.dot_dimension_numbers<[1], [0], [0], [1], [0, 0, 1, 1], [], []>} : vector<64x32xf32>, vector<32x128xf32>, vector<64x128xf32> -> vector<64x128xf32>
    %c0_130 = arith.constant 0 : index
    %c0_131 = arith.constant 0 : index
    %530 = vector.load %arg6[%c0_130, %c0_131] : memref<1x128xf32, #tpu.memory_space<vmem>>, vector<1x128xf32>
    %531 = vector.broadcast %530 : vector<1x128xf32> to vector<64x128xf32>
    %532 = arith.addf %529, %531 : vector<64x128xf32>
    %533 = math.tanh %532 : vector<64x128xf32>
    %c0_132 = arith.constant 0 : index
    %c0_133 = arith.constant 0 : index
    %534 = vector.load %arg7[%c0_132, %c0_133] : memref<128x128xf32, #tpu.memory_space<vmem>>, vector<128x128xf32>
    %cst_134 = arith.constant dense<0.000000e+00> : vector<64x128xf32>
    %535 = tpu.matmul %533, %534, %cst_134 {dimension_numbers = #tpu.dot_dimension_numbers<[1], [0], [0], [1], [0, 0, 1, 1], [], []>} : vector<64x128xf32>, vector<128x128xf32>, vector<64x128xf32> -> vector<64x128xf32>
    %c0_135 = arith.constant 0 : index
    %c0_136 = arith.constant 0 : index
    %536 = vector.load %arg8[%c0_135, %c0_136] : memref<1x128xf32, #tpu.memory_space<vmem>>, vector<1x128xf32>
    %537 = vector.broadcast %536 : vector<1x128xf32> to vector<64x128xf32>
    %538 = arith.addf %535, %537 : vector<64x128xf32>
    %c0_137 = arith.constant 0 : index
    %c0_138 = arith.constant 0 : index
    %539 = vector.load %arg9[%c0_137, %c0_138] : memref<64x128xf32, #tpu.memory_space<vmem>>, vector<64x128xf32>
    tpu.vector_store %arg9[%c0_137, %c0_138], %538 {strides = array<i32>} : memref<64x128xf32, #tpu.memory_space<vmem>>, vector<64x128xf32>,
    return
  }
}

</mosaic_0001>

<bundles_post_ra>
// kernel: tpu_custom_call.1
= control target key start
LH: loop header
LB: loop body
LE: loop exit
PB: predicated region body
PF: predicated region fallthrough
CT: control target
= control target key end

     0   :  { %14 = vsyncpa [#allocation5], 0  ;;  %s4204_s0 = inlined_call_operand.vmem [shape: f32[64,32], index: 0, kind: input, shape index: {}]   ;;  %s4205_s1 = inlined_call_operand.vmem [shape: f32[2,32,128], index: 1, kind: input, shape index: {}]   ;;  %s4206_s2 = inlined_call_operand.hbm [shape: f32[2,32,128], index: 2, kind: input, shape index: {}]   ;;  %s4207_s3 = inlined_call_operand.vmem [shape: f32[2,1,128], index: 3, kind: input, shape index: {}]   ;;  %s4208_s4 = inlined_call_operand.vmem [shape: f32[2,1,128], index: 4, kind: input, shape index: {}]   ;;  %s4209_s5 = inlined_call_operand.vmem [shape: f32[32,128], index: 5, kind: input, shape index: {}]   ;;  %s4210_s6 = inlined_call_operand.vmem [shape: f32[1,128], index: 6, kind: input, shape index: {}]   ;;  %s4211_s7 = inlined_call_operand.hbm [shape: f32[128,128], index: 7, kind: input, shape index: {}]   ;;  %s4212_s8 = inlined_call_operand.vmem [shape: f32[1,128], index: 8, kind: input, shape index: {}]   ;;  %s4213_s9 = inlined_call_operand.hbm [shape: f32[64,128], index: 9, kind: output, shape index: {}]  }
   0x1   :  { %15 = vsyncpa [#allocation8], 0 }
   0x2   :  { %16 = vsyncpa [#allocation6], 0  ;;  %s3536_s30 = smov [#allocation4]  }
   0x3   :  { %s26_s10 = sshll.u32 %s3536_s30, 4  ;;  %s27_s10 = int_to_ptr.vmem [resolvable:$true] %s26_s10 }
   0x4   :  { %s3478_s11 = scalar_lea.vmem %s27_s10, 1024  ;;  %p3483_p1 = scmp.lt.s32.totalorder %s27_s10, %s27_s10 }
   0x5   :  { %p3479_p0 = scmp.ne.s32.totalorder %s27_s10, %s3478_s11  ;;  %p3484_p2 = scmp.lt.s32.totalorder %s3478_s11, %s3478_s11 }
   0x7   :  { %p3485_p3 = por %p3484_p2, %p3483_p1 }
   0x9   :  { %p3486_p4 = pnand %p3485_p3, %p3479_p0 }
   0xb   :  { %3489 = shalt.err (!%p3486_p4)
}
   0xc   :  { %s3537_s12 = smov 128   ;;  %s3538_s13 = smov 8  }
   0xd   :  { %32 = dma.hbm_to_vmem [thread:$0]  %s4206_s2, 1024, %s27_s10, [#allocation5], %s3537_s12, %s3537_s12, %s3538_s13  }
   0xe   :  { %s3539_s16 = smov [#allocation7]  }
   0xf   :  { %s46_s17 = sshll.u32 %s3539_s16, 4  ;;  %s47_s17 = int_to_ptr.vmem [resolvable:$true] %s46_s17 }
  0x10   :  { %s3498_s18 = scalar_lea.vmem %s47_s17, 2048  ;;  %p3503_p6 = scmp.lt.s32.totalorder %s47_s17, %s47_s17 }
  0x11   :  { %p3499_p5 = scmp.ne.s32.totalorder %s47_s17, %s3498_s18  ;;  %p3504_p7 = scmp.lt.s32.totalorder %s3498_s18, %s3498_s18 }
  0x13   :  { %p3505_p8 = por %p3504_p7, %p3503_p6 }
  0x15   :  { %p3506_p9 = pnand %p3505_p8, %p3499_p5 }
  0x17   :  { %3509 = shalt.err (!%p3506_p9)
}
  0x18   :  { %52 = dma.hbm_to_vmem [thread:$0]  %s4211_s7, 2048, %s47_s17, [#allocation8], %s3537_s12, %s3537_s12, %s3538_s13  }
  0x19   :  { %3530 = dma.done.wait [#allocation5], 1024  }
  0x1a   :  { %3531 = vsyncadd [#allocation5], 4294966272 }
  0x1b   :  { %3532 = dma.done.wait [#allocation8], 2048  }
  0x1c   :  { %3533 = vsyncadd [#allocation8], 4294965248  ;;  %v3540_v0 = vmov 0.0   ;;  %vm3541_vm0 = vmmov 0   ;;  %vm80_vm1 = vcmask 261120   ;;  %v72_v1 = vld [vmem:[%s4205_s1 + $0x18] sm:$0xff] }
  0x1d   :  { %3031 = vmatprep.subr.mxu1 %v3540_v0  ;;  %3039 = vmatprep.mubr.msk.f32.mxu1 %vm3541_vm0, %v3540_v0  ;;  %v71_v2 = vld [vmem:[%s4205_s1 + $0x10] sm:$0xff]  ;;  %v61_v3 = vld [vmem:[%s4204_s0] sm:$0xff]  ;;  %v70_v4 = vld [vmem:[%s4205_s1 + $0x8] sm:$0xff]  ;;  %s3542_s25 = smov 64   ;;  %s3543_s26 = smov 96  }
  0x1e   :  { %3000 = vmatprep.subr.mxu0 %v72_v1  ;;  %3008 = vmatprep.mubr.msk.f32.mxu0 %vm80_vm1, %v61_v3  ;;  %v3623_v5 = vld [vmem:[#allocation4 + $0x18] sm:$0xff]  ;;  %v69_v6 = vld [vmem:[%s4205_s1] sm:$0xff]  ;;  %v3629_v7 = vld [vmem:[#allocation4 + $0x10] sm:$0xff] }
  0x1f   :  { %3001 = vmatpush3.msra.mxu0 %v72_v1  ;;  %3032 = vmatpush3.msra.mxu1 %v3623_v5  ;;  %v62_v8 = vld [vmem:[%s4204_s0 + $0x8] sm:$0xff]  ;;  %v63_v10 = vld [vmem:[%s4204_s0 + $0x10] sm:$0xff]  ;;  %v64_v11 = vld [vmem:[%s4204_s0 + $0x18] sm:$0xff] }
  0x20   :  { %3002 = vmatprep.subr.mxu0 %v71_v2  ;;  %3033 = vmatprep.subr.mxu1 %v3540_v0  ;;  %v3636_v9 = vld [vmem:[#allocation4 + $0x8] sm:$0xff]  ;;  %v3651_v12 = vld [vmem:[#allocation4] sm:$0xff]  ;;  %v67_v15 = vld [vmem:[%s4204_s0 + $0x30] sm:$0xff] }
  0x21   :  { %3003 = vmatpush3.msra.mxu0 %v71_v2  ;;  %3034 = vmatpush3.msra.mxu1 %v3629_v7  ;;  %v65_v13 = vld [vmem:[%s4204_s0 + $0x20] sm:$0xff]  ;;  %v66_v14 = vld [vmem:[%s4204_s0 + $0x28] sm:$0xff]  ;;  %v68_v16 = vld [vmem:[%s4204_s0 + $0x38] sm:$0xff] }
  0x22   :  { %3004 = vmatprep.subr.mxu0 %v70_v4  ;;  %3035 = vmatprep.subr.mxu1 %v3540_v0  ;;  %v2766_v17 = vld [vmem:[%s4207_s3] ss:$0 sm:$0xff] }
  0x23   :  { %3005 = vmatpush3.msra.mxu0 %v70_v4  ;;  %3036 = vmatpush3.msra.mxu1 %v3636_v9  ;;  %v3710_v32 = vld [vmem:[%s4208_s4] ss:$0 sm:$0xff] }
  0x24   :  { %3006 = vmatprep.subr.mxu0 %v69_v6  ;;  %3037 = vmatprep.subr.mxu1 %v3540_v0 }
  0x25   :  { %3007 = vmatpush3.msra.mxu0 %v69_v6  ;;  %3038 = vmatpush3.msra.mxu1 %v3651_v12 }
  0x26   :  { %3009 = vmatmul.mubr.msk.f32.vlgmr.msra.gmra.mxu0 %vm80_vm1, %v62_v8  ;;  %3020 = vmatprep.subr.mxu0 %v3540_v0 }
  0x27   :  { %3021 = vmatpush3.msra.mxu0 %v3623_v5  ;;  %3011 = vmatprep.mubr.msk.f32.mxu0 %vm80_vm1, %v63_v10 }
  0x28   :  { %3022 = vmatprep.subr.mxu0 %v3540_v0  ;;  %3053 = vmatprep.subr.mxu1 %v3540_v0 }
  0x29   :  { %3023 = vmatpush3.msra.mxu0 %v3629_v7 }
  0x2a   :  { %3012 = vmatmul.mubr.msk.f32.gmra.mxu0 %vm80_vm1, %v64_v11  ;;  %3024 = vmatprep.subr.mxu0 %v3540_v0 }
  0x2b   :  { %3014 = vmatprep.mubr.msk.f32.mxu0 %vm80_vm1, %v65_v13  ;;  %3025 = vmatpush3.msra.mxu0 %v3636_v9 }
  0x2c   :  { %3026 = vmatprep.subr.mxu0 %v3540_v0 }
  0x2d   :  { %3027 = vmatpush3.msra.mxu0 %v3651_v12 }
  0x2e   :  { %3015 = vmatmul.mubr.msk.f32.gmra.mxu0 %vm80_vm1, %v66_v14  ;;  %3042 = vmatprep.subr.mxu0 %v3540_v0 }
  0x2f   :  { %3017 = vmatprep.mubr.msk.f32.mxu0 %vm80_vm1, %v67_v15 }
  0x32   :  { %3018 = vmatmul.mubr.msk.f32.gmra.mxu0 %vm80_vm1, %v68_v16 }
  0x33   :  { %3028 = vmatprep.mubr.msk.f32.mxu0 %vm3541_vm0, %v3540_v0 }
  0x36   :  { %3029 = vmatmul.mubr.f32.vlgmr.msra.gmra.mxu0 %v3540_v0 }
  0x37   :  { %3043 = vmatpush3.msra.mxu0 %v3623_v5  ;;  %3050 = vmatprep.mubr.msk.f32.mxu0 %vm3541_vm0, %v3540_v0 }
  0x38   :  { %3044 = vmatprep.subr.mxu0 %v3540_v0 }
  0x39   :  { %3045 = vmatpush3.msra.mxu0 %v3629_v7 }
  0x3a   :  { %3046 = vmatprep.subr.mxu0 %v3540_v0 }
  0x3b   :  { %3047 = vmatpush3.msra.mxu0 %v3636_v9 }
  0x3c   :  { %3048 = vmatprep.subr.mxu0 %v3540_v0 }
  0x3d   :  { %3049 = vmatpush3.msra.mxu0 %v3651_v12 }
  0x3e   :  { %3064 = vmatprep.subr.mxu0 %v3540_v0 }
  0xe6   :  { %v3010_v18 = vpop.f32.mrf.mxu0 }
  0xe7   :  { %v3695_v19 = vadd.f32 %v3010_v18, %v2766_v17 }
  0xe8   :  { %v171_v20 = vpop.f32.mrf.mxu0 }
  0xe9   :  { %v172_v37 = vadd.f32 %v2766_v17, %v171_v20 }
  0xea   :  { %v3013_v21 = vpop.f32.mrf.mxu0 }
  0xeb   :  { %v3697_v22 = vadd.f32 %v3013_v21, %v2766_v17 }
  0xec   :  { %v181_v23 = vpop.f32.mrf.mxu0 }
  0xed   :  { %v3699_v24 = vadd.f32 %v2766_v17, %v181_v23 }
  0xee   :  { %v3016_v25 = vpop.f32.mrf.mxu0 }
  0xef   :  { %v3701_v26 = vadd.f32 %v3016_v25, %v2766_v17 }
  0xf0   :  { %v191_v27 = vpop.f32.mrf.mxu0 }
  0xf1   :  { %v3703_v28 = vadd.f32 %v2766_v17, %v191_v27 }
  0xf2   :  { %v3019_v29 = vpop.f32.mrf.mxu0 }
  0xf3   :  { %v3705_v30 = vadd.f32 %v3019_v29, %v2766_v17 }
  0xf4   :  { %v201_v31 = vpop.f32.mrf.mxu0 }
  0xf5   :  { %v3712_v33 = vadd.f32 %v2766_v17, %v201_v31 }
  0xf6   :  { %v299_v34 = vpop.f32.mrf.mxu0 }
  0xf7   :  { %v300_v35 = vadd.f32 %v3710_v32, %v299_v34 }
  0xf8   :  { %v3030_v36 = vpop.f32.mrf.mxu0 }
  0xf9   :  { %311 = vrot.lane.b32.xlu0 %v300_v35, %s3542_s25  ;;  %v303_v38 = vadd.f32 %v300_v35, %v172_v37 }
  0xfb   :  { %v2776_v39 = vmul.f32 -1.442695, %v303_v38 }
  0xfd   :  { %3357 = vpow2.f32 %v2776_v39 }
 0x10a   :  { %v3358_v40 = vpop.eup %3357 }
 0x10b   :  { %v307_v41 = vadd.f32 1.0, %v3358_v40 }
 0x10d   :  { %3359 = vrcp.f32 %v307_v41 }
 0x11a   :  { %v3360_v42 = vpop.eup %3359 }
 0x11b   :  { %v321_v48 = vsub.f32 1.0, %v3360_v42  ;;  %v327_v50 = vmul.f32 0.0, %v3360_v42 }
 0x16b   :  { %v312_v43 = vpop.permute.xlu0 %311 }
 0x16c   :  { %v314_v44 = vmul.f32 %v3360_v42, %v312_v43 }
 0x16e   :  { %316 = vrot.lane.b32.xlu0 %v314_v44, %s3542_s25 }
 0x1e0   :  { %v317_v45 = vpop.permute.xlu0 %316 }
 0x1e1   :  { %v319_v46 = vadd.f32 %v317_v45, %v172_v37 }
 0x1e3   :  { %3361 = vtanh.f32 %v319_v46 }
 0x1f0   :  { %v3362_v47 = vpop.eup %3361 }
 0x1f1   :  { %323 = vrot.lane.b32.xlu1 %v3362_v47, %s3543_s26 }
 0x263   :  { %v324_v49 = vpop.permute.xlu1 %323 }
 0x264   :  { %v326_v51 = vmul.f32 %v324_v49, %v321_v48 }
 0x266   :  { %v328_v52 = vadd.f32 %v327_v50, %v326_v51 }
 0x268   :  { %331 = vrot.lane.b32.xlu1 %v328_v52, %s3543_s26 }
 0x2da   :  { %v3719_v53 = vpop.permute.xlu1 %331 }
 0x2db   :  { %3040 = vmatmul.mubr.msk.f32.vlgmr.msra.gmra.mxu1 %vm80_vm1, %v3719_v53 }
 0x2dc   :  { %3054 = vmatpush3.msra.mxu1 %v3623_v5  ;;  %3061 = vmatprep.mubr.msk.f32.mxu1 %vm3541_vm0, %v3540_v0 }
 0x2dd   :  { %3055 = vmatprep.subr.mxu1 %v3540_v0 }
 0x2de   :  { %3056 = vmatpush3.msra.mxu1 %v3629_v7 }
 0x2df   :  { %3057 = vmatprep.subr.mxu1 %v3540_v0 }
 0x2e0   :  { %3058 = vmatpush3.msra.mxu1 %v3636_v9 }
 0x2e1   :  { %3059 = vmatprep.subr.mxu1 %v3540_v0 }
 0x2e2   :  { %3060 = vmatpush3.msra.mxu1 %v3651_v12 }
 0x2e3   :  { %3075 = vmatprep.subr.mxu1 %v3540_v0 }
 0x39b   :  { %v401_v54 = vpop.f32.mrf.mxu1 }
 0x39c   :  { %v402_v55 = vadd.f32 %v3710_v32, %v401_v54 }
 0x39d   :  { %v3041_v56 = vpop.f32.mrf.mxu1 }
 0x39e   :  { %413 = vrot.lane.b32.xlu0 %v402_v55, %s3542_s25  ;;  %v405_v57 = vadd.f32 %v402_v55, %v3695_v19 }
 0x3a0   :  { %v2778_v58 = vmul.f32 -1.442695, %v405_v57 }
 0x3a2   :  { %3363 = vpow2.f32 %v2778_v58 }
 0x3af   :  { %v3364_v59 = vpop.eup %3363 }
 0x3b0   :  { %v409_v60 = vadd.f32 1.0, %v3364_v59 }
 0x3b2   :  { %3365 = vrcp.f32 %v409_v60 }
 0x3bf   :  { %v3366_v61 = vpop.eup %3365 }
 0x3c0   :  { %v423_v4 = vsub.f32 1.0, %v3366_v61  ;;  %v429_v8 = vmul.f32 %v3366_v61, %v328_v52 }
 0x410   :  { %v414_v62 = vpop.permute.xlu0 %413 }
 0x411   :  { %v416_v63 = vmul.f32 %v3366_v61, %v414_v62 }
 0x413   :  { %418 = vrot.lane.b32.xlu1 %v416_v63, %s3542_s25 }
 0x485   :  { %v419_v1 = vpop.permute.xlu1 %418 }
 0x486   :  { %v421_v2 = vadd.f32 %v419_v1, %v3695_v19 }
 0x488   :  { %3367 = vtanh.f32 %v421_v2 }
 0x495   :  { %v3368_v3 = vpop.eup %3367 }
 0x496   :  { %425 = vrot.lane.b32.xlu0 %v3368_v3, %s3543_s26 }
 0x508   :  { %v426_v6 = vpop.permute.xlu0 %425 }
 0x509   :  { %v428_v10 = vmul.f32 %v426_v6, %v423_v4 }
 0x50b   :  { %v430_v11 = vadd.f32 %v429_v8, %v428_v10 }
 0x50d   :  { %433 = vrot.lane.b32.xlu1 %v430_v11, %s3543_s26 }
 0x57f   :  { %v3740_v13 = vpop.permute.xlu1 %433 }
 0x580   :  { %3051 = vmatmul.mubr.msk.f32.vlgmr.msra.gmra.mxu0 %vm80_vm1, %v3740_v13 }
 0x581   :  { %3065 = vmatpush3.msra.mxu0 %v3623_v5  ;;  %3072 = vmatprep.mubr.msk.f32.mxu0 %vm3541_vm0, %v3540_v0 }
 0x582   :  { %3066 = vmatprep.subr.mxu0 %v3540_v0 }
 0x583   :  { %3067 = vmatpush3.msra.mxu0 %v3629_v7 }
 0x584   :  { %3068 = vmatprep.subr.mxu0 %v3540_v0 }
 0x585   :  { %3069 = vmatpush3.msra.mxu0 %v3636_v9 }
 0x586   :  { %3070 = vmatprep.subr.mxu0 %v3540_v0 }
 0x587   :  { %3071 = vmatpush3.msra.mxu0 %v3651_v12 }
 0x588   :  { %3086 = vmatprep.subr.mxu0 %v3540_v0 }
 0x640   :  { %v503_v14 = vpop.f32.mrf.mxu0 }
 0x641   :  { %v504_v15 = vadd.f32 %v3710_v32, %v503_v14 }
 0x642   :  { %v3052_v16 = vpop.f32.mrf.mxu0 }
 0x643   :  { %515 = vrot.lane.b32.xlu0 %v504_v15, %s3542_s25  ;;  %v507_v17 = vadd.f32 %v504_v15, %v3699_v24 }
 0x645   :  { %v2780_v18 = vmul.f32 -1.442695, %v507_v17 }
 0x647   :  { %3369 = vpow2.f32 %v2780_v18 }
 0x654   :  { %v3370_v19 = vpop.eup %3369 }
 0x655   :  { %v511_v20 = vadd.f32 1.0, %v3370_v19 }
 0x657   :  { %3371 = vrcp.f32 %v511_v20 }
 0x664   :  { %v3372_v21 = vpop.eup %3371 }
 0x665   :  { %v525_v34 = vsub.f32 1.0, %v3372_v21  ;;  %v531_v36 = vmul.f32 %v3372_v21, %v430_v11 }
 0x6b5   :  { %v516_v23 = vpop.permute.xlu0 %515 }
 0x6b6   :  { %v518_v25 = vmul.f32 %v3372_v21, %v516_v23 }
 0x6b8   :  { %520 = vrot.lane.b32.xlu1 %v518_v25, %s3542_s25 }
 0x72a   :  { %v521_v27 = vpop.permute.xlu1 %520 }
 0x72b   :  { %v523_v29 = vadd.f32 %v521_v27, %v3699_v24 }
 0x72d   :  { %3373 = vtanh.f32 %v523_v29 }
 0x73a   :  { %v3374_v31 = vpop.eup %3373 }
 0x73b   :  { %527 = vrot.lane.b32.xlu0 %v3374_v31, %s3543_s26 }
 0x7ad   :  { %v528_v35 = vpop.permute.xlu0 %527 }
 0x7ae   :  { %v530_v37 = vmul.f32 %v528_v35, %v525_v34 }
 0x7b0   :  { %v532_v38 = vadd.f32 %v531_v36, %v530_v37 }
 0x7b2   :  { %535 = vrot.lane.b32.xlu1 %v532_v38, %s3543_s26 }
 0x824   :  { %v3761_v39 = vpop.permute.xlu1 %535 }
 0x825   :  { %3062 = vmatmul.mubr.msk.f32.vlgmr.msra.gmra.mxu1 %vm80_vm1, %v3761_v39 }
 0x826   :  { %3076 = vmatpush3.msra.mxu1 %v3623_v5  ;;  %3083 = vmatprep.mubr.msk.f32.mxu1 %vm3541_vm0, %v3540_v0 }
 0x827   :  { %3077 = vmatprep.subr.mxu1 %v3540_v0 }
 0x828   :  { %3078 = vmatpush3.msra.mxu1 %v3629_v7 }
 0x829   :  { %3079 = vmatprep.subr.mxu1 %v3540_v0 }
 0x82a   :  { %3080 = vmatpush3.msra.mxu1 %v3636_v9 }
 0x82b   :  { %3081 = vmatprep.subr.mxu1 %v3540_v0 }
 0x82c   :  { %3082 = vmatpush3.msra.mxu1 %v3651_v12 }
 0x82d   :  { %3097 = vmatprep.subr.mxu1 %v3540_v0 }
 0x8e5   :  { %v605_v24 = vpop.f32.mrf.mxu1 }
 0x8e6   :  { %v606_v40 = vadd.f32 %v3710_v32, %v605_v24  ;;  %v3830_v24 = vld [vmem:[%s4205_s1 + $0x38] sm:$0xff] }
 0x8e7   :  { %v3063_v41 = vpop.f32.mrf.mxu1 }
 0x8e8   :  { %617 = vrot.lane.b32.xlu0 %v606_v40, %s3542_s25  ;;  %v609_v42 = vadd.f32 %v606_v40, %v3697_v22  ;;  %v3848_v41 = vld [vmem:[%s4205_s1 + $0x28] sm:$0xff] }
 0x8ea   :  { %v2782_v43 = vmul.f32 -1.442695, %v609_v42  ;;  %v3855_v42 = vld [vmem:[%s4205_s1 + $0x20] sm:$0xff] }
 0x8ec   :  { %3375 = vpow2.f32 %v2782_v43 }
 0x8f9   :  { %v3376_v44 = vpop.eup %3375 }
 0x8fa   :  { %v613_v45 = vadd.f32 1.0, %v3376_v44 }
 0x8fc   :  { %3377 = vrcp.f32 %v613_v45 }
 0x909   :  { %v3378_v46 = vpop.eup %3377 }
 0x90a   :  { %v627_v52 = vsub.f32 1.0, %v3378_v46  ;;  %v633_v55 = vmul.f32 %v3378_v46, %v532_v38 }
 0x95a   :  { %v618_v47 = vpop.permute.xlu0 %617 }
 0x95b   :  { %v620_v48 = vmul.f32 %v3378_v46, %v618_v47 }
 0x95d   :  { %622 = vrot.lane.b32.xlu1 %v620_v48, %s3542_s25 }
 0x9cf   :  { %v623_v49 = vpop.permute.xlu1 %622 }
 0x9d0   :  { %v625_v50 = vadd.f32 %v623_v49, %v3697_v22 }
 0x9d2   :  { %3379 = vtanh.f32 %v625_v50 }
 0x9df   :  { %v3380_v51 = vpop.eup %3379 }
 0x9e0   :  { %629 = vrot.lane.b32.xlu0 %v3380_v51, %s3543_s26 }
 0xa52   :  { %v630_v54 = vpop.permute.xlu0 %629 }
 0xa53   :  { %v632_v56 = vmul.f32 %v630_v54, %v627_v52 }
 0xa55   :  { %v634_v57 = vadd.f32 %v633_v55, %v632_v56 }
 0xa57   :  { %637 = vrot.lane.b32.xlu1 %v634_v57, %s3543_s26 }
 0xac9   :  { %v3782_v58 = vpop.permute.xlu1 %637 }
 0xaca   :  { %3073 = vmatmul.mubr.msk.f32.vlgmr.msra.gmra.mxu0 %vm80_vm1, %v3782_v58 }
 0xacb   :  { %3087 = vmatpush3.msra.mxu0 %v3623_v5  ;;  %3094 = vmatprep.mubr.msk.f32.mxu0 %vm3541_vm0, %v3540_v0 }
 0xacc   :  { %3088 = vmatprep.subr.mxu0 %v3540_v0 }
 0xacd   :  { %3089 = vmatpush3.msra.mxu0 %v3629_v7 }
 0xace   :  { %3090 = vmatprep.subr.mxu0 %v3540_v0 }
 0xacf   :  { %3091 = vmatpush3.msra.mxu0 %v3636_v9 }
 0xad0   :  { %3092 = vmatprep.subr.mxu0 %v3540_v0 }
 0xad1   :  { %3093 = vmatpush3.msra.mxu0 %v3651_v12 }
 0xad2   :  { %3108 = vmatprep.subr.mxu0 %v3540_v0 }
 0xb8a   :  { %v707_v22 = vpop.f32.mrf.mxu0 }
 0xb8b   :  { %v708_v59 = vadd.f32 %v3710_v32, %v707_v22 }
 0xb8c   :  { %v3074_v60 = vpop.f32.mrf.mxu0 }
 0xb8d   :  { %719 = vrot.lane.b32.xlu0 %v708_v59, %s3542_s25  ;;  %v711_v61 = vadd.f32 %v708_v59, %v3703_v28 }
 0xb8f   :  { %v2784_v62 = vmul.f32 -1.442695, %v711_v61 }
 0xb91   :  { %3381 = vpow2.f32 %v2784_v62 }
 0xb9e   :  { %v3382_v63 = vpop.eup %3381 }
 0xb9f   :  { %v715_v1 = vadd.f32 1.0, %v3382_v63 }
 0xba1   :  { %3383 = vrcp.f32 %v715_v1 }
 0xbae   :  { %v3384_v2 = vpop.eup %3383 }
 0xbaf   :  { %v729_v11 = vsub.f32 1.0, %v3384_v2  ;;  %v735_v15 = vmul.f32 %v3384_v2, %v634_v57 }
 0xbff   :  { %v720_v3 = vpop.permute.xlu0 %719 }
 0xc00   :  { %v722_v4 = vmul.f32 %v3384_v2, %v720_v3 }
 0xc02   :  { %724 = vrot.lane.b32.xlu1 %v722_v4, %s3542_s25 }
 0xc74   :  { %v725_v6 = vpop.permute.xlu1 %724 }
 0xc75   :  { %v727_v8 = vadd.f32 %v725_v6, %v3703_v28 }
 0xc77   :  { %3385 = vtanh.f32 %v727_v8  ;;  %v3956_v8 = vld [vmem:[#allocation4 + $0x38] sm:$0xff] }
 0xc84   :  { %v3386_v10 = vpop.eup %3385 }
 0xc85   :  { %731 = vrot.lane.b32.xlu0 %v3386_v10, %s3543_s26 }
 0xcf7   :  { %v732_v14 = vpop.permute.xlu0 %731 }
 0xcf8   :  { %v734_v16 = vmul.f32 %v732_v14, %v729_v11  ;;  %v3966_v11 = vld [vmem:[#allocation4 + $0x28] sm:$0xff]  ;;  %v3972_v14 = vld [vmem:[#allocation4 + $0x20] sm:$0xff] }
 0xcfa   :  { %v736_v17 = vadd.f32 %v735_v15, %v734_v16 }
 0xcfc   :  { %739 = vrot.lane.b32.xlu1 %v736_v17, %s3543_s26 }
 0xd6e   :  { %v3803_v18 = vpop.permute.xlu1 %739 }
 0xd6f   :  { %3084 = vmatmul.mubr.msk.f32.vlgmr.msra.gmra.mxu1 %vm80_vm1, %v3803_v18 }
 0xd70   :  { %3098 = vmatpush3.msra.mxu1 %v3623_v5  ;;  %3105 = vmatprep.mubr.msk.f32.mxu1 %vm3541_vm0, %v3540_v0 }
 0xd71   :  { %3099 = vmatprep.subr.mxu1 %v3540_v0 }
 0xd72   :  { %3100 = vmatpush3.msra.mxu1 %v3629_v7 }
 0xd73   :  { %3101 = vmatprep.subr.mxu1 %v3540_v0 }
 0xd74   :  { %3102 = vmatpush3.msra.mxu1 %v3636_v9 }
 0xd75   :  { %3103 = vmatprep.subr.mxu1 %v3540_v0 }
 0xd76   :  { %3104 = vmatpush3.msra.mxu1 %v3651_v12 }
 0xd77   :  { %3119 = vmatprep.subr.mxu1 %v3540_v0 }
 0xe2f   :  { %v809_v28 = vpop.f32.mrf.mxu1 }
 0xe30   :  { %v810_v5 = vadd.f32 %v3710_v32, %v809_v28  ;;  %v4003_v28 = vld [vmem:[%s4208_s4 + $0x1] ss:$0 sm:$0xff] }
 0xe31   :  { %v3085_v19 = vpop.f32.mrf.mxu1 }
 0xe32   :  { %821 = vrot.lane.b32.xlu0 %v810_v5, %s3542_s25  ;;  %v813_v20 = vadd.f32 %v810_v5, %v3701_v26 }
 0xe34   :  { %v2786_v21 = vmul.f32 -1.442695, %v813_v20 }
 0xe36   :  { %3387 = vpow2.f32 %v2786_v21  ;;  %v4010_v21 = vld [vmem:[%s4207_s3 + $0x1] ss:$0 sm:$0xff] }
 0xe43   :  { %v3388_v7 = vpop.eup %3387 }
 0xe44   :  { %v817_v23 = vadd.f32 1.0, %v3388_v7 }
 0xe46   :  { %3389 = vrcp.f32 %v817_v23 }
 0xe53   :  { %v3390_v9 = vpop.eup %3389 }
 0xe54   :  { %v831_v34 = vsub.f32 1.0, %v3390_v9  ;;  %v837_v36 = vmul.f32 %v3390_v9, %v736_v17 }
 0xea4   :  { %v822_v25 = vpop.permute.xlu0 %821 }
 0xea5   :  { %v824_v27 = vmul.f32 %v3390_v9, %v822_v25 }
 0xea7   :  { %826 = vrot.lane.b32.xlu1 %v824_v27, %s3542_s25 }
 0xf19   :  { %v827_v12 = vpop.permute.xlu1 %826 }
 0xf1a   :  { %v829_v29 = vadd.f32 %v827_v12, %v3701_v26  ;;  %v3839_v26 = vld [vmem:[%s4205_s1 + $0x30] sm:$0xff] }
 0xf1c   :  { %3391 = vtanh.f32 %v829_v29 }
 0xf29   :  { %v3392_v31 = vpop.eup %3391 }
 0xf2a   :  { %833 = vrot.lane.b32.xlu0 %v3392_v31, %s3543_s26 }
 0xf9c   :  { %v834_v35 = vpop.permute.xlu0 %833 }
 0xf9d   :  { %v836_v37 = vmul.f32 %v834_v35, %v831_v34 }
 0xf9f   :  { %v3823_v38 = vadd.f32 %v837_v36, %v836_v37 }
 0xfa1   :  { %841 = vrot.lane.b32.xlu1 %v3823_v38, %s3543_s26 }
0x1013   :  { %v3832_v40 = vpop.permute.xlu1 %841 }
0x1014   :  { %3095 = vmatmul.mubr.msk.f32.vlgmr.msra.gmra.mxu0 %vm80_vm1, %v3832_v40 }
0x1015   :  { %3109 = vmatpush3.msra.mxu0 %v3830_v24  ;;  %3116 = vmatprep.mubr.msk.f32.mxu0 %vm3541_vm0, %v3540_v0 }
0x1016   :  { %3110 = vmatprep.subr.mxu0 %v3540_v0 }
0x1017   :  { %3111 = vmatpush3.msra.mxu0 %v3839_v26 }
0x1018   :  { %3112 = vmatprep.subr.mxu0 %v3540_v0 }
0x1019   :  { %3113 = vmatpush3.msra.mxu0 %v3848_v41 }
0x101a   :  { %3114 = vmatprep.subr.mxu0 %v3540_v0 }
0x101b   :  { %3115 = vmatpush3.msra.mxu0 %v3855_v42 }
0x101c   :  { %3117 = vmatmul.mubr.msk.f32.vlgmr.msra.gmra.mxu0 %vm80_vm1, %v3719_v53  ;;  %3130 = vmatprep.subr.mxu0 %v3540_v0 }
0x101d   :  { %3131 = vmatpush3.msra.mxu0 %v3830_v24  ;;  %3138 = vmatprep.mubr.msk.f32.mxu0 %vm3541_vm0, %v3540_v0 }
0x101e   :  { %3132 = vmatprep.subr.mxu0 %v3540_v0 }
0x101f   :  { %3133 = vmatpush3.msra.mxu0 %v3839_v26 }
0x1020   :  { %3134 = vmatprep.subr.mxu0 %v3540_v0 }
0x1021   :  { %3135 = vmatpush3.msra.mxu0 %v3848_v41 }
0x1022   :  { %3136 = vmatprep.subr.mxu0 %v3540_v0 }
0x1023   :  { %3137 = vmatpush3.msra.mxu0 %v3855_v42 }
0x1024   :  { %3139 = vmatmul.mubr.msk.f32.vlgmr.msra.gmra.mxu0 %vm80_vm1, %v3740_v13  ;;  %3152 = vmatprep.subr.mxu0 %v3540_v0 }
0x1025   :  { %3153 = vmatpush3.msra.mxu0 %v3830_v24  ;;  %3160 = vmatprep.mubr.msk.f32.mxu0 %vm3541_vm0, %v3540_v0 }
0x1026   :  { %3154 = vmatprep.subr.mxu0 %v3540_v0 }
0x1027   :  { %3155 = vmatpush3.msra.mxu0 %v3839_v26 }
0x1028   :  { %3156 = vmatprep.subr.mxu0 %v3540_v0 }
0x1029   :  { %3157 = vmatpush3.msra.mxu0 %v3848_v41 }
0x102a   :  { %3158 = vmatprep.subr.mxu0 %v3540_v0 }
0x102b   :  { %3159 = vmatpush3.msra.mxu0 %v3855_v42 }
0x102c   :  { %3161 = vmatmul.mubr.msk.f32.vlgmr.msra.gmra.mxu0 %vm80_vm1, %v3761_v39  ;;  %3174 = vmatprep.subr.mxu0 %v3540_v0 }
0x102d   :  { %3175 = vmatpush3.msra.mxu0 %v3830_v24  ;;  %3182 = vmatprep.mubr.msk.f32.mxu0 %vm3541_vm0, %v3540_v0 }
0x102e   :  { %3176 = vmatprep.subr.mxu0 %v3540_v0 }
0x102f   :  { %3177 = vmatpush3.msra.mxu0 %v3839_v26 }
0x1030   :  { %3178 = vmatprep.subr.mxu0 %v3540_v0 }
0x1031   :  { %3179 = vmatpush3.msra.mxu0 %v3848_v41 }
0x1032   :  { %3180 = vmatprep.subr.mxu0 %v3540_v0 }
0x1033   :  { %3181 = vmatpush3.msra.mxu0 %v3855_v42 }
0x1034   :  { %3183 = vmatmul.mubr.msk.f32.vlgmr.msra.gmra.mxu0 %vm80_vm1, %v3782_v58  ;;  %3196 = vmatprep.subr.mxu0 %v3540_v0 }
0x1035   :  { %3197 = vmatpush3.msra.mxu0 %v3830_v24  ;;  %3204 = vmatprep.mubr.msk.f32.mxu0 %vm3541_vm0, %v3540_v0 }
0x1036   :  { %3198 = vmatprep.subr.mxu0 %v3540_v0 }
0x1037   :  { %3199 = vmatpush3.msra.mxu0 %v3839_v26 }
0x1038   :  { %3200 = vmatprep.subr.mxu0 %v3540_v0 }
0x1039   :  { %3201 = vmatpush3.msra.mxu0 %v3848_v41 }
0x103a   :  { %3202 = vmatprep.subr.mxu0 %v3540_v0 }
0x103b   :  { %3203 = vmatpush3.msra.mxu0 %v3855_v42 }
0x103c   :  { %3205 = vmatmul.mubr.msk.f32.vlgmr.msra.gmra.mxu0 %vm80_vm1, %v3803_v18  ;;  %3218 = vmatprep.subr.mxu0 %v3540_v0 }
0x103d   :  { %3219 = vmatpush3.msra.mxu0 %v3830_v24  ;;  %3226 = vmatprep.mubr.msk.f32.mxu0 %vm3541_vm0, %v3540_v0 }
0x103e   :  { %3220 = vmatprep.subr.mxu0 %v3540_v0 }
0x103f   :  { %3221 = vmatpush3.msra.mxu0 %v3839_v26 }
0x1040   :  { %3222 = vmatprep.subr.mxu0 %v3540_v0 }
0x1041   :  { %3223 = vmatpush3.msra.mxu0 %v3848_v41 }
0x1042   :  { %3224 = vmatprep.subr.mxu0 %v3540_v0 }
0x1043   :  { %3225 = vmatpush3.msra.mxu0 %v3855_v42 }
0x1044   :  { %3227 = vmatmul.mubr.msk.f32.vlgmr.msra.gmra.mxu0 %vm80_vm1, %v3832_v40  ;;  %3240 = vmatprep.subr.mxu0 %v3540_v0 }
0x1045   :  { %3241 = vmatpush3.msra.mxu0 %v3830_v24  ;;  %3248 = vmatprep.mubr.msk.f32.mxu0 %vm3541_vm0, %v3540_v0 }
0x1046   :  { %3242 = vmatprep.subr.mxu0 %v3540_v0 }
0x1047   :  { %3243 = vmatpush3.msra.mxu0 %v3839_v26 }
0x1048   :  { %3244 = vmatprep.subr.mxu0 %v3540_v0 }
0x1049   :  { %3245 = vmatpush3.msra.mxu0 %v3848_v41 }
0x104a   :  { %3246 = vmatprep.subr.mxu0 %v3540_v0 }
0x104b   :  { %3247 = vmatpush3.msra.mxu0 %v3855_v42 }
0x104c   :  { %3262 = vmatprep.subr.mxu0 %v3540_v0 }
0x10d4   :  { %v911_v53 = vpop.f32.mrf.mxu0 }
0x10d5   :  { %v912_v13 = vadd.f32 %v3710_v32, %v911_v53 }
0x10d6   :  { %v3096_v39 = vpop.f32.mrf.mxu0 }
0x10d7   :  { %923 = vrot.lane.b32.xlu0 %v912_v13, %s3542_s25  ;;  %v915_v55 = vadd.f32 %v912_v13, %v3712_v33 }
0x10d9   :  { %v2788_v56 = vmul.f32 -1.442695, %v915_v55 }
0x10db   :  { %3393 = vpow2.f32 %v2788_v56 }
0x10dc   :  { %v3935_v43 = vpop.f32.mrf.mxu0 }
0x10dd   :  { %v1130_v7 = vadd.f32 %v4010_v21, %v3935_v43 }
0x10de   :  { %v3118_v44 = vpop.f32.mrf.mxu0 }
0x10e4   :  { %v3937_v45 = vpop.f32.mrf.mxu0 }
0x10e5   :  { %v1307_v39 = vadd.f32 %v4010_v21, %v3937_v45 }
0x10e6   :  { %v3140_v46 = vpop.f32.mrf.mxu0 }
0x10e8   :  { %v3394_v57 = vpop.eup %3393 }
0x10e9   :  { %v919_v58 = vadd.f32 1.0, %v3394_v57 }
0x10eb   :  { %3395 = vrcp.f32 %v919_v58 }
0x10ec   :  { %v3939_v47 = vpop.f32.mrf.mxu0 }
0x10ee   :  { %v3162_v48 = vpop.f32.mrf.mxu0 }
0x10f4   :  { %v3941_v49 = vpop.f32.mrf.mxu0 }
0x10f6   :  { %v3184_v50 = vpop.f32.mrf.mxu0 }
0x10f8   :  { %v3396_v22 = vpop.eup %3395 }
0x10f9   :  { %v933_v1 = vsub.f32 1.0, %v3396_v22  ;;  %v939_v3 = vmul.f32 %v3396_v22, %v3823_v38 }
0x10fc   :  { %v3943_v51 = vpop.f32.mrf.mxu0 }
0x10fe   :  { %v3206_v52 = vpop.f32.mrf.mxu0 }
0x1104   :  { %v3945_v54 = vpop.f32.mrf.mxu0 }
0x1106   :  { %v3228_v32 = vpop.f32.mrf.mxu0 }
0x1149   :  { %v924_v59 = vpop.permute.xlu0 %923 }
0x114a   :  { %v926_v60 = vmul.f32 %v3396_v22, %v924_v59 }
0x114c   :  { %928 = vrot.lane.b32.xlu1 %v926_v60, %s3542_s25 }
0x11be   :  { %v929_v61 = vpop.permute.xlu1 %928 }
0x11bf   :  { %v931_v62 = vadd.f32 %v929_v61, %v3712_v33  ;;  %v3960_v33 = vld [vmem:[#allocation4 + $0x30] sm:$0xff] }
0x11c1   :  { %3397 = vtanh.f32 %v931_v62 }
0x11ce   :  { %v3398_v63 = vpop.eup %3397 }
0x11cf   :  { %935 = vrot.lane.b32.xlu0 %v3398_v63, %s3543_s26 }
0x1241   :  { %v936_v2 = vpop.permute.xlu0 %935 }
0x1242   :  { %v938_v4 = vmul.f32 %v936_v2, %v933_v1  ;;  %v1480_v2 = vadd.f32 %v4010_v21, %v3939_v47 }
0x1244   :  { %v3952_v6 = vadd.f32 %v939_v3, %v938_v4 }
0x1246   :  { %943 = vrot.lane.b32.xlu1 %v3952_v6, %s3543_s26 }
0x12b8   :  { %v944_v10 = vpop.permute.xlu1 %943 }
0x12b9   :  { %3106 = vmatmul.mubr.msk.f32.vlgmr.msra.gmra.mxu1 %vm80_vm1, %v944_v10  ;;  %3249 = vmatmul.mubr.msk.f32.vlgmr.msra.gmra.mxu0 %vm80_vm1, %v944_v10 }
0x12ba   :  { %3120 = vmatpush3.msra.mxu1 %v3956_v8  ;;  %3127 = vmatprep.mubr.msk.f32.mxu1 %vm3541_vm0, %v3540_v0 }
0x12bb   :  { %3121 = vmatprep.subr.mxu1 %v3540_v0  ;;  %3263 = vmatpush3.msra.mxu0 %v3830_v24 }
0x12bc   :  { %3122 = vmatpush3.msra.mxu1 %v3960_v33  ;;  %3264 = vmatprep.subr.mxu0 %v3540_v0 }
0x12bd   :  { %3123 = vmatprep.subr.mxu1 %v3540_v0  ;;  %3265 = vmatpush3.msra.mxu0 %v3839_v26 }
0x12be   :  { %3124 = vmatpush3.msra.mxu1 %v3966_v11  ;;  %3266 = vmatprep.subr.mxu0 %v3540_v0 }
0x12bf   :  { %3125 = vmatprep.subr.mxu1 %v3540_v0  ;;  %3267 = vmatpush3.msra.mxu0 %v3848_v41 }
0x12c0   :  { %3126 = vmatpush3.msra.mxu1 %v3972_v14  ;;  %3268 = vmatprep.subr.mxu0 %v3540_v0 }
0x12c1   :  { %3128 = vmatmul.mubr.f32.vlgmr.msra.gmra.mxu1 %v3540_v0  ;;  %3141 = vmatprep.subr.mxu1 %v3540_v0 }
0x12c2   :  { %3142 = vmatpush3.msra.mxu1 %v3956_v8  ;;  %3149 = vmatprep.mubr.msk.f32.mxu1 %vm3541_vm0, %v3540_v0 }
0x12c3   :  { %3143 = vmatprep.subr.mxu1 %v3540_v0  ;;  %3269 = vmatpush3.msra.mxu0 %v3855_v42 }
0x12c4   :  { %3144 = vmatpush3.msra.mxu1 %v3960_v33  ;;  %3270 = vmatprep.mubr.msk.f32.mxu0 %vm3541_vm0, %v3540_v0 }
0x12c5   :  { %3145 = vmatprep.subr.mxu1 %v3540_v0 }
0x12c6   :  { %3146 = vmatpush3.msra.mxu1 %v3966_v11 }
0x12c7   :  { %3147 = vmatprep.subr.mxu1 %v3540_v0 }
0x12c8   :  { %3148 = vmatpush3.msra.mxu1 %v3972_v14 }
0x12c9   :  { %3163 = vmatprep.subr.mxu1 %v3540_v0 }
0x1379   :  { %v3996_v15 = vpop.f32.mrf.mxu1  ;;  %v3998_v16 = vpop.f32.mrf.mxu0 }
0x137b   :  { %v3107_v17 = vpop.f32.mrf.mxu1  ;;  %v3250_v18 = vpop.f32.mrf.mxu0 }
0x1381   :  { %v1205_v5 = vpop.f32.mrf.mxu1 }
0x1382   :  { %v1206_v19 = vadd.f32 %v4003_v28, %v1205_v5 }
0x1383   :  { %v3129_v20 = vpop.f32.mrf.mxu1 }
0x1384   :  { %1217 = vrot.lane.b32.xlu0 %v1206_v19, %s3542_s25  ;;  %v1209_v23 = vadd.f32 %v1206_v19, %v1130_v7 }
0x1386   :  { %v2800_v9 = vmul.f32 -1.442695, %v1209_v23 }
0x1388   :  { %3399 = vpow2.f32 %v2800_v9 }
0x1395   :  { %v3400_v25 = vpop.eup %3399 }
0x1396   :  { %v1213_v27 = vadd.f32 1.0, %v3400_v25 }
0x1398   :  { %3401 = vrcp.f32 %v1213_v27 }
0x13a5   :  { %v3402_v12 = vpop.eup %3401 }
0x13a6   :  { %v1227_v37 = vsub.f32 1.0, %v3402_v12  ;;  %v1233_v24 = vmul.f32 0.0, %v3402_v12 }
0x13f6   :  { %v1218_v29 = vpop.permute.xlu0 %1217 }
0x13f7   :  { %v1220_v31 = vmul.f32 %v3402_v12, %v1218_v29 }
0x13f9   :  { %1222 = vrot.lane.b32.xlu1 %v1220_v31, %s3542_s25 }
0x146b   :  { %v1223_v34 = vpop.permute.xlu1 %1222 }
0x146c   :  { %v1225_v35 = vadd.f32 %v1223_v34, %v1130_v7 }
0x146e   :  { %3403 = vtanh.f32 %v1225_v35 }
0x147b   :  { %v3404_v36 = vpop.eup %3403 }
0x147c   :  { %1229 = vrot.lane.b32.xlu0 %v3404_v36, %s3543_s26  ;;  %v1653_v36 = vadd.f32 %v4010_v21, %v3941_v49 }
0x14ee   :  { %v1230_v38 = vpop.permute.xlu0 %1229 }
0x14ef   :  { %v1232_v40 = vmul.f32 %v1230_v38, %v1227_v37 }
0x14f1   :  { %v1234_v26 = vadd.f32 %v1233_v24, %v1232_v40 }
0x14f3   :  { %1236 = vrot.lane.b32.xlu1 %v1234_v26, %s3543_s26 }
0x1565   :  { %v1237_v41 = vpop.permute.xlu1 %1236 }
0x1566   :  { %1239 = vst.msk [vmem:[#allocation3] sm:$0xff] %vm80_vm1, %v1237_v41  ;;  %3150 = vmatmul.mubr.msk.f32.vlgmr.msra.gmra.mxu1 %vm80_vm1, %v1237_v41 }
0x1567   :  { %3164 = vmatpush3.msra.mxu1 %v3956_v8  ;;  %3171 = vmatprep.mubr.msk.f32.mxu1 %vm3541_vm0, %v3540_v0 }
0x1568   :  { %3165 = vmatprep.subr.mxu1 %v3540_v0 }
0x1569   :  { %3166 = vmatpush3.msra.mxu1 %v3960_v33 }
0x156a   :  { %3167 = vmatprep.subr.mxu1 %v3540_v0 }
0x156b   :  { %3168 = vmatpush3.msra.mxu1 %v3966_v11 }
0x156c   :  { %3169 = vmatprep.subr.mxu1 %v3540_v0 }
0x156d   :  { %3170 = vmatpush3.msra.mxu1 %v3972_v14 }
0x156e   :  { %3185 = vmatprep.subr.mxu1 %v3540_v0 }
0x1626   :  { %v1378_v42 = vpop.f32.mrf.mxu1 }
0x1627   :  { %v1379_v53 = vadd.f32 %v4003_v28, %v1378_v42 }
0x1628   :  { %v3151_v13 = vpop.f32.mrf.mxu1 }
0x1629   :  { %1390 = vrot.lane.b32.xlu0 %v1379_v53, %s3542_s25  ;;  %v1382_v43 = vadd.f32 %v1379_v53, %v1307_v39 }
0x162b   :  { %v2803_v44 = vmul.f32 -1.442695, %v1382_v43 }
0x162d   :  { %3405 = vpow2.f32 %v2803_v44 }
0x163a   :  { %v3406_v46 = vpop.eup %3405 }
0x163b   :  { %v1386_v48 = vadd.f32 1.0, %v3406_v46 }
0x163d   :  { %3407 = vrcp.f32 %v1386_v48 }
0x164a   :  { %v3408_v50 = vpop.eup %3407 }
0x164b   :  { %v1400_v58 = vsub.f32 1.0, %v3408_v50  ;;  %v1406_v45 = vmul.f32 %v3408_v50, %v1234_v26 }
0x169b   :  { %v1391_v52 = vpop.permute.xlu0 %1390 }
0x169c   :  { %v1393_v32 = vmul.f32 %v3408_v50, %v1391_v52 }
0x169e   :  { %1395 = vrot.lane.b32.xlu1 %v1393_v32, %s3542_s25 }
0x1710   :  { %v1396_v55 = vpop.permute.xlu1 %1395 }
0x1711   :  { %v1398_v56 = vadd.f32 %v1396_v55, %v1307_v39 }
0x1713   :  { %3409 = vtanh.f32 %v1398_v56  ;;  %v1826_v56 = vadd.f32 %v4010_v21, %v3943_v51 }
0x1720   :  { %v3410_v57 = vpop.eup %3409 }
0x1721   :  { %1402 = vrot.lane.b32.xlu0 %v3410_v57, %s3543_s26 }
0x1793   :  { %v1403_v22 = vpop.permute.xlu0 %1402 }
0x1794   :  { %v1405_v59 = vmul.f32 %v1403_v22, %v1400_v58 }
0x1796   :  { %v1407_v60 = vadd.f32 %v1406_v45, %v1405_v59 }
0x1798   :  { %1409 = vrot.lane.b32.xlu1 %v1407_v60, %s3543_s26 }
0x180a   :  { %v1410_v61 = vpop.permute.xlu1 %1409 }
0x180b   :  { %1412 = vst.msk [vmem:[#allocation3 + $0x8] sm:$0xff] %vm80_vm1, %v1410_v61  ;;  %3172 = vmatmul.mubr.msk.f32.vlgmr.msra.gmra.mxu1 %vm80_vm1, %v1410_v61 }
0x180c   :  { %3186 = vmatpush3.msra.mxu1 %v3956_v8  ;;  %3193 = vmatprep.mubr.msk.f32.mxu1 %vm3541_vm0, %v3540_v0 }
0x180d   :  { %3187 = vmatprep.subr.mxu1 %v3540_v0 }
0x180e   :  { %3188 = vmatpush3.msra.mxu1 %v3960_v33 }
0x180f   :  { %3189 = vmatprep.subr.mxu1 %v3540_v0 }
0x1810   :  { %3190 = vmatpush3.msra.mxu1 %v3966_v11 }
0x1811   :  { %3191 = vmatprep.subr.mxu1 %v3540_v0 }
0x1812   :  { %3192 = vmatpush3.msra.mxu1 %v3972_v14 }
0x1813   :  { %3207 = vmatprep.subr.mxu1 %v3540_v0 }
0x18cb   :  { %v1551_v62 = vpop.f32.mrf.mxu1 }
0x18cc   :  { %v1552_v63 = vadd.f32 %v4003_v28, %v1551_v62 }
0x18cd   :  { %v3173_v1 = vpop.f32.mrf.mxu1 }
0x18ce   :  { %1563 = vrot.lane.b32.xlu0 %v1552_v63, %s3542_s25  ;;  %v1555_v3 = vadd.f32 %v1552_v63, %v1480_v2 }
0x18d0   :  { %v2806_v4 = vmul.f32 -1.442695, %v1555_v3 }
0x18d2   :  { %3411 = vpow2.f32 %v2806_v4 }
0x18df   :  { %v3412_v10 = vpop.eup %3411 }
0x18e0   :  { %v1559_v17 = vadd.f32 1.0, %v3412_v10 }
0x18e2   :  { %3413 = vrcp.f32 %v1559_v17 }
0x18ef   :  { %v3414_v18 = vpop.eup %3413 }
0x18f0   :  { %v1573_v9 = vsub.f32 1.0, %v3414_v18  ;;  %v1579_v47 = vmul.f32 %v3414_v18, %v1407_v60 }
0x1940   :  { %v1564_v5 = vpop.permute.xlu0 %1563 }
0x1941   :  { %v1566_v19 = vmul.f32 %v3414_v18, %v1564_v5 }
0x1943   :  { %1568 = vrot.lane.b32.xlu1 %v1566_v19, %s3542_s25 }
0x19b5   :  { %v1569_v20 = vpop.permute.xlu1 %1568 }
0x19b6   :  { %v1571_v7 = vadd.f32 %v1569_v20, %v1480_v2  ;;  %v1999_v20 = vadd.f32 %v4010_v21, %v3945_v54 }
0x19b8   :  { %3415 = vtanh.f32 %v1571_v7 }
0x19c5   :  { %v3416_v23 = vpop.eup %3415 }
0x19c6   :  { %1575 = vrot.lane.b32.xlu0 %v3416_v23, %s3543_s26 }
0x1a38   :  { %v1576_v25 = vpop.permute.xlu0 %1575 }
0x1a39   :  { %v1578_v27 = vmul.f32 %v1576_v25, %v1573_v9 }
0x1a3b   :  { %v1580_v12 = vadd.f32 %v1579_v47, %v1578_v27 }
0x1a3d   :  { %1582 = vrot.lane.b32.xlu1 %v1580_v12, %s3543_s26 }
0x1aaf   :  { %v1583_v29 = vpop.permute.xlu1 %1582 }
0x1ab0   :  { %1585 = vst.msk [vmem:[#allocation3 + $0x10] sm:$0xff] %vm80_vm1, %v1583_v29  ;;  %3194 = vmatmul.mubr.msk.f32.vlgmr.msra.gmra.mxu1 %vm80_vm1, %v1583_v29 }
0x1ab1   :  { %3208 = vmatpush3.msra.mxu1 %v3956_v8  ;;  %3215 = vmatprep.mubr.msk.f32.mxu1 %vm3541_vm0, %v3540_v0 }
0x1ab2   :  { %3209 = vmatprep.subr.mxu1 %v3540_v0 }
0x1ab3   :  { %3210 = vmatpush3.msra.mxu1 %v3960_v33 }
0x1ab4   :  { %3211 = vmatprep.subr.mxu1 %v3540_v0 }
0x1ab5   :  { %3212 = vmatpush3.msra.mxu1 %v3966_v11 }
0x1ab6   :  { %3213 = vmatprep.subr.mxu1 %v3540_v0 }
0x1ab7   :  { %3214 = vmatpush3.msra.mxu1 %v3972_v14 }
0x1ab8   :  { %3229 = vmatprep.subr.mxu1 %v3540_v0 }
0x1b70   :  { %v1724_v31 = vpop.f32.mrf.mxu1 }
0x1b71   :  { %v1725_v34 = vadd.f32 %v4003_v28, %v1724_v31 }
0x1b72   :  { %v3195_v35 = vpop.f32.mrf.mxu1 }
0x1b73   :  { %1736 = vrot.lane.b32.xlu0 %v1725_v34, %s3542_s25  ;;  %v1728_v37 = vadd.f32 %v1725_v34, %v1653_v36 }
0x1b75   :  { %v2809_v38 = vmul.f32 -1.442695, %v1728_v37 }
0x1b77   :  { %3417 = vpow2.f32 %v2809_v38 }
0x1b84   :  { %v3418_v24 = vpop.eup %3417 }
0x1b85   :  { %v1732_v40 = vadd.f32 1.0, %v3418_v24  ;;  %v3469_v24 = vld [vmem:[%s4208_s4] ss:$0 sm:$0xff] }
0x1b87   :  { %3419 = vrcp.f32 %v1732_v40  ;;  %v1014_v40 = vadd.f32 %v3469_v24, %v3996_v15 }
0x1b94   :  { %v3420_v26 = vpop.eup %3419 }
0x1b95   :  { %v1746_v43 = vsub.f32 1.0, %v3420_v26  ;;  %v1752_v49 = vmul.f32 %v3420_v26, %v1580_v12 }
0x1be5   :  { %v1737_v41 = vpop.permute.xlu0 %1736 }
0x1be6   :  { %v1739_v42 = vmul.f32 %v3420_v26, %v1737_v41  ;;  %v1017_v26 = vadd.f32 %v1014_v40, %v3705_v30 }
0x1be8   :  { %1741 = vrot.lane.b32.xlu1 %v1739_v42, %s3542_s25  ;;  %v2790_v41 = vmul.f32 -1.442695, %v1017_v26 }
0x1c5a   :  { %v1742_v53 = vpop.permute.xlu1 %1741 }
0x1c5b   :  { %v1744_v13 = vadd.f32 %v1742_v53, %v1653_v36 }
0x1c5d   :  { %3421 = vtanh.f32 %v1744_v13 }
0x1c6a   :  { %v3422_v39 = vpop.eup %3421 }
0x1c6b   :  { %1748 = vrot.lane.b32.xlu0 %v3422_v39, %s3543_s26 }
0x1cdd   :  { %v1749_v44 = vpop.permute.xlu0 %1748 }
0x1cde   :  { %v1751_v46 = vmul.f32 %v1749_v44, %v1746_v43 }
0x1ce0   :  { %v1753_v48 = vadd.f32 %v1752_v49, %v1751_v46 }
0x1ce2   :  { %1755 = vrot.lane.b32.xlu1 %v1753_v48, %s3543_s26 }
0x1d54   :  { %v1756_v50 = vpop.permute.xlu1 %1755 }
0x1d55   :  { %1758 = vst.msk [vmem:[#allocation3 + $0x18] sm:$0xff] %vm80_vm1, %v1756_v50  ;;  %3216 = vmatmul.mubr.msk.f32.vlgmr.msra.gmra.mxu1 %vm80_vm1, %v1756_v50 }
0x1d56   :  { %3230 = vmatpush3.msra.mxu1 %v3956_v8  ;;  %3237 = vmatprep.mubr.msk.f32.mxu1 %vm3541_vm0, %v3540_v0 }
0x1d57   :  { %3231 = vmatprep.subr.mxu1 %v3540_v0 }
0x1d58   :  { %3232 = vmatpush3.msra.mxu1 %v3960_v33 }
0x1d59   :  { %3233 = vmatprep.subr.mxu1 %v3540_v0 }
0x1d5a   :  { %3234 = vmatpush3.msra.mxu1 %v3966_v11 }
0x1d5b   :  { %3235 = vmatprep.subr.mxu1 %v3540_v0 }
0x1d5c   :  { %3236 = vmatpush3.msra.mxu1 %v3972_v14 }
0x1d5d   :  { %3251 = vmatprep.subr.mxu1 %v3540_v0 }
0x1e15   :  { %v1897_v52 = vpop.f32.mrf.mxu1 }
0x1e16   :  { %v1898_v32 = vadd.f32 %v4003_v28, %v1897_v52 }
0x1e17   :  { %v3217_v55 = vpop.f32.mrf.mxu1 }
0x1e18   :  { %1909 = vrot.lane.b32.xlu0 %v1898_v32, %s3542_s25  ;;  %v1901_v57 = vadd.f32 %v1898_v32, %v1826_v56  ;;  %v2172_v32 = vadd.f32 %v4010_v21, %v3998_v16  ;;  %v2465_v16 = vld [vmem:[%s4209_s5 + $0x8] sm:$0xff] }
0x1e1a   :  { %v2812_v58 = vmul.f32 -1.442695, %v1901_v57 }
0x1e1c   :  { %3423 = vpow2.f32 %v2812_v58 }
0x1e29   :  { %v3424_v22 = vpop.eup %3423 }
0x1e2a   :  { %v1905_v45 = vadd.f32 1.0, %v3424_v22 }
0x1e2c   :  { %3425 = vrcp.f32 %v1905_v45 }
0x1e39   :  { %v3426_v59 = vpop.eup %3425 }
0x1e3a   :  { %v1919_v2 = vsub.f32 1.0, %v3426_v59  ;;  %v1925_v51 = vmul.f32 %v3426_v59, %v1753_v48 }
0x1e8a   :  { %v1910_v60 = vpop.permute.xlu0 %1909 }
0x1e8b   :  { %v1912_v61 = vmul.f32 %v3426_v59, %v1910_v60 }
0x1e8d   :  { %1914 = vrot.lane.b32.xlu1 %v1912_v61, %s3542_s25  ;;  %v2456_v61 = vld [vmem:[#allocation3] sm:$0xff] }
0x1eff   :  { %v1915_v62 = vpop.permute.xlu1 %1914 }
0x1f00   :  { %v1917_v63 = vadd.f32 %v1915_v62, %v1826_v56  ;;  %v2464_v62 = vld [vmem:[%s4209_s5] sm:$0xff] }
0x1f02   :  { %3427 = vtanh.f32 %v1917_v63  ;;  %v2457_v63 = vld [vmem:[#allocation3 + $0x8] sm:$0xff] }
0x1f0f   :  { %v3428_v1 = vpop.eup %3427 }
0x1f10   :  { %1921 = vrot.lane.b32.xlu0 %v3428_v1, %s3543_s26  ;;  %v2458_v1 = vld [vmem:[#allocation3 + $0x10] sm:$0xff] }
0x1f82   :  { %v1922_v3 = vpop.permute.xlu0 %1921 }
0x1f83   :  { %v1924_v4 = vmul.f32 %v1922_v3, %v1919_v2  ;;  %v2459_v2 = vld [vmem:[#allocation3 + $0x18] sm:$0xff] }
0x1f85   :  { %v1926_v10 = vadd.f32 %v1925_v51, %v1924_v4 }
0x1f87   :  { %1928 = vrot.lane.b32.xlu1 %v1926_v10, %s3543_s26 }
0x1ff9   :  { %v1929_v17 = vpop.permute.xlu1 %1928 }
0x1ffa   :  { %1931 = vst.msk [vmem:[#allocation3 + $0x20] sm:$0xff] %vm80_vm1, %v1929_v17  ;;  %3238 = vmatmul.mubr.msk.f32.vlgmr.msra.gmra.mxu1 %vm80_vm1, %v1929_v17 }
0x1ffb   :  { %3252 = vmatpush3.msra.mxu1 %v3956_v8  ;;  %3259 = vmatprep.mubr.msk.f32.mxu1 %vm3541_vm0, %v3540_v0 }
0x1ffc   :  { %3253 = vmatprep.subr.mxu1 %v3540_v0 }
0x1ffd   :  { %3254 = vmatpush3.msra.mxu1 %v3960_v33 }
0x1ffe   :  { %3255 = vmatprep.subr.mxu1 %v3540_v0 }
0x1fff   :  { %3256 = vmatpush3.msra.mxu1 %v3966_v11 }
0x2000   :  { %3257 = vmatprep.subr.mxu1 %v3540_v0 }
0x2001   :  { %3258 = vmatpush3.msra.mxu1 %v3972_v14  ;;  %v2460_v3 = vld [vmem:[#allocation3 + $0x20] sm:$0xff] }
0x2002   :  { %3273 = vmatprep.subr.mxu1 %v3540_v0 }
0x20ba   :  { %v2070_v18 = vpop.f32.mrf.mxu1 }
0x20bb   :  { %v2071_v5 = vadd.f32 %v4003_v28, %v2070_v18  ;;  %v2627_v18 = vld [vmem:[#allocation7 + $0x78] sm:$0xff] }
0x20bc   :  { %v3239_v19 = vpop.f32.mrf.mxu1 }
0x20bd   :  { %2082 = vrot.lane.b32.xlu0 %v2071_v5, %s3542_s25  ;;  %v2074_v7 = vadd.f32 %v2071_v5, %v1999_v20 }
0x20bf   :  { %v2815_v23 = vmul.f32 -1.442695, %v2074_v7 }
0x20c1   :  { %3429 = vpow2.f32 %v2815_v23 }
0x20ce   :  { %v3430_v9 = vpop.eup %3429 }
0x20cf   :  { %v2078_v25 = vadd.f32 1.0, %v3430_v9 }
0x20d1   :  { %3431 = vrcp.f32 %v2078_v25 }
0x20de   :  { %v3432_v47 = vpop.eup %3431 }
0x20df   :  { %v2092_v35 = vsub.f32 1.0, %v3432_v47  ;;  %v2098_v54 = vmul.f32 %v3432_v47, %v1926_v10 }
0x212f   :  { %v2083_v27 = vpop.permute.xlu0 %2082 }
0x2130   :  { %v2085_v12 = vmul.f32 %v3432_v47, %v2083_v27 }
0x2132   :  { %2087 = vrot.lane.b32.xlu1 %v2085_v12, %s3542_s25  ;;  %v4172_v12 = vld [vmem:[%s4210_s6] ss:$0 sm:$0xff] }
0x21a4   :  { %v2088_v29 = vpop.permute.xlu1 %2087 }
0x21a5   :  { %v2090_v31 = vadd.f32 %v2088_v29, %v1999_v20 }
0x21a7   :  { %3433 = vtanh.f32 %v2090_v31 }
0x21a8   :  { %3435 = vpow2.f32 %v2790_v41  ;;  %v2621_v41 = vld [vmem:[#allocation7 + $0x48] sm:$0xff] }
0x21b4   :  { %v3434_v34 = vpop.eup %3433 }
0x21b5   :  { %2094 = vrot.lane.b32.xlu0 %v3434_v34, %s3543_s26  ;;  %v3436_v42 = vpop.eup %3435  ;;  %v2626_v34 = vld [vmem:[#allocation7 + $0x70] sm:$0xff] }
0x21b6   :  { %v1021_v53 = vadd.f32 1.0, %v3436_v42  ;;  %v2620_v42 = vld [vmem:[#allocation7 + $0x40] sm:$0xff] }
0x21b8   :  { %3437 = vrcp.f32 %v1021_v53 }
0x21c5   :  { %v3438_v15 = vpop.eup %3437 }
0x21c6   :  { %v1041_v50 = vmul.f32 %v3438_v15, %v3952_v6  ;;  %v2466_v6 = vld [vmem:[%s4209_s5 + $0x10] sm:$0xff] }
0x2227   :  { %v2095_v36 = vpop.permute.xlu0 %2094 }
0x2228   :  { %v2097_v37 = vmul.f32 %v2095_v36, %v2092_v35  ;;  %v2625_v36 = vld [vmem:[#allocation7 + $0x68] sm:$0xff] }
0x222a   :  { %v4111_v38 = vadd.f32 %v2098_v54, %v2097_v37  ;;  %v2624_v54 = vld [vmem:[#allocation7 + $0x60] sm:$0xff] }
0x222c   :  { %2101 = vrot.lane.b32.xlu1 %v4111_v38, %s3543_s26 }
0x2230   :  { %1025 = vrot.lane.b32.xlu1 %v1014_v40, %s3542_s25  ;;  %v2622_v40 = vld [vmem:[#allocation7 + $0x50] sm:$0xff] }
0x229e   :  { %v2102_v13 = vpop.permute.xlu1 %2101 }
0x229f   :  { %2104 = vst.msk [vmem:[#allocation3 + $0x28] sm:$0xff] %vm80_vm1, %v2102_v13  ;;  %3260 = vmatmul.mubr.msk.f32.vlgmr.msra.gmra.mxu1 %vm80_vm1, %v2102_v13  ;;  %v2619_v13 = vld [vmem:[#allocation7 + $0x38] sm:$0xff] }
0x22a0   :  { %3274 = vmatpush3.msra.mxu1 %v3956_v8  ;;  %3281 = vmatprep.mubr.msk.f32.mxu1 %vm3541_vm0, %v3540_v0 }
0x22a1   :  { %3275 = vmatprep.subr.mxu1 %v3540_v0 }
0x22a2   :  { %v1026_v39 = vpop.permute.xlu1 %1025  ;;  %3276 = vmatpush3.msra.mxu1 %v3960_v33  ;;  %v2467_v33 = vld [vmem:[%s4209_s5 + $0x18] sm:$0xff] }
0x22a3   :  { %v1028_v43 = vmul.f32 %v3438_v15, %v1026_v39  ;;  %3277 = vmatprep.subr.mxu1 %v3540_v0  ;;  %3284 = vmatprep.subr.mxu0 %v2467_v33 }
0x22a4   :  { %3278 = vmatpush3.msra.mxu1 %v3966_v11 }
0x22a5   :  { %1030 = vrot.lane.b32.xlu1 %v1028_v43, %s3542_s25  ;;  %3279 = vmatprep.subr.mxu1 %v3540_v0  ;;  %v1035_v0 = vsub.f32 1.0, %v3438_v15  ;;  %v2618_v43 = vld [vmem:[#allocation7 + $0x30] sm:$0xff] }
0x22a6   :  { %3280 = vmatpush3.msra.mxu1 %v3972_v14  ;;  %v2461_v51 = vld [vmem:[#allocation3 + $0x28] sm:$0xff] }
0x22a7   :  { %3304 = vmatprep.subr.mxu1 %v2627_v18 }
0x2317   :  { %v1031_v8 = vpop.permute.xlu1 %1030 }
0x2318   :  { %v1033_v44 = vadd.f32 %v1031_v8, %v3705_v30 }
0x231a   :  { %3439 = vtanh.f32 %v1033_v44  ;;  %v2617_v44 = vld [vmem:[#allocation7 + $0x28] sm:$0xff] }
0x2327   :  { %v3440_v49 = vpop.eup %3439 }
0x2328   :  { %1037 = vrot.lane.b32.xlu1 %v3440_v49, %s3543_s26 }
0x235f   :  { %v2243_v46 = vpop.f32.mrf.mxu1 }
0x2360   :  { %v2244_v11 = vadd.f32 %v4003_v28, %v2243_v46  ;;  %v2616_v46 = vld [vmem:[#allocation7 + $0x20] sm:$0xff] }
0x2361   :  { %v3261_v48 = vpop.f32.mrf.mxu1 }
0x2362   :  { %2255 = vrot.lane.b32.xlu0 %v2244_v11, %s3542_s25  ;;  %v2247_v55 = vadd.f32 %v2244_v11, %v2172_v32  ;;  %v2615_v11 = vld [vmem:[#allocation7 + $0x18] sm:$0xff] }
0x2364   :  { %v2818_v56 = vmul.f32 -1.442695, %v2247_v55 }
0x2366   :  { %3441 = vpow2.f32 %v2818_v56 }
0x2373   :  { %v3442_v57 = vpop.eup %3441 }
0x2374   :  { %v2251_v58 = vadd.f32 1.0, %v3442_v57 }
0x2376   :  { %3443 = vrcp.f32 %v2251_v58 }
0x2383   :  { %v3444_v22 = vpop.eup %3443 }
0x2384   :  { %v2265_v5 = vsub.f32 1.0, %v3444_v22  ;;  %v2271_v20 = vmul.f32 %v3444_v22, %v4111_v38  ;;  %v2623_v38 = vld [vmem:[#allocation7 + $0x58] sm:$0xff] }
0x239a   :  { %v1038_v14 = vpop.permute.xlu1 %1037 }
0x239b   :  { %v1040_v30 = vmul.f32 %v1038_v14, %v1035_v0  ;;  %v2614_v0 = vld [vmem:[#allocation7 + $0x10] sm:$0xff]  ;;  %v2613_v14 = vld [vmem:[#allocation7 + $0x8] sm:$0xff] }
0x239d   :  { %v1042_v52 = vadd.f32 %v1041_v50, %v1040_v30  ;;  %v2612_v50 = vld [vmem:[#allocation7] sm:$0xff] }
0x239f   :  { %2279 = vrot.lane.b32.xlu1 %v1042_v52, %s3543_s26 }
0x23d4   :  { %v2256_v45 = vpop.permute.xlu0 %2255 }
0x23d5   :  { %v2258_v59 = vmul.f32 %v3444_v22, %v2256_v45  ;;  %v2831_v45 = vld [vmem:[%s4212_s8] ss:$0 sm:$0xff]  ;;  %s3544_s8 = smov [#allocation9]  }
0x23d7   :  { %2260 = vrot.lane.b32.xlu0 %v2258_v59, %s3542_s25 }
0x2411   :  { %v2280_v60 = vpop.permute.xlu1 %2279 }
0x2412   :  { %3271 = vmatmul.mubr.msk.f32.vlgmr.msra.gmra.mxu0 %vm80_vm1, %v2280_v60 }
0x2413   :  { %3285 = vmatpush3.msra.mxu0 %v2467_v33  ;;  %3292 = vmatprep.mubr.msk.f32.mxu0 %vm80_vm1, %v2456_v61 }
0x2414   :  { %3286 = vmatprep.subr.mxu0 %v2466_v6 }
0x2415   :  { %3287 = vmatpush3.msra.mxu0 %v2466_v6 }
0x2416   :  { %3288 = vmatprep.subr.mxu0 %v2465_v16 }
0x2417   :  { %3289 = vmatpush3.msra.mxu0 %v2465_v16 }
0x2418   :  { %3290 = vmatprep.subr.mxu0 %v2464_v62 }
0x2419   :  { %3291 = vmatpush3.msra.mxu0 %v2464_v62 }
0x241a   :  { %3293 = vmatmul.mubr.msk.f32.vlgmr.msra.gmra.mxu0 %vm80_vm1, %v2457_v63 }
0x241b   :  { %3295 = vmatprep.mubr.msk.f32.mxu0 %vm80_vm1, %v2458_v1 }
0x241e   :  { %3296 = vmatmul.mubr.msk.f32.gmra.mxu0 %vm80_vm1, %v2459_v2 }
0x241f   :  { %3298 = vmatprep.mubr.msk.f32.mxu0 %vm80_vm1, %v2460_v3 }
0x2422   :  { %3299 = vmatmul.mubr.msk.f32.gmra.mxu0 %vm80_vm1, %v2461_v51 }
0x2449   :  { %v2261_v4 = vpop.permute.xlu0 %2260 }
0x244a   :  { %v2263_v10 = vadd.f32 %v2261_v4, %v2172_v32 }
0x244c   :  { %3445 = vtanh.f32 %v2263_v10 }
0x2459   :  { %v3446_v17 = vpop.eup %3445 }
0x245a   :  { %2267 = vrot.lane.b32.xlu0 %v3446_v17, %s3543_s26 }
0x24cc   :  { %v2268_v19 = vpop.permute.xlu0 %2267 }
0x24cd   :  { %v2270_v7 = vmul.f32 %v2268_v19, %v2265_v5 }
0x24cf   :  { %v4163_v23 = vadd.f32 %v2271_v20, %v2270_v7 }
0x24d1   :  { %2274 = vrot.lane.b32.xlu0 %v4163_v23, %s3543_s26 }
0x24d2   :  { %v4167_v9 = vpop.f32.mrf.mxu0 }
0x24d3   :  { %v2350_v4 = vadd.f32 %v4010_v21, %v4167_v9 }
0x24d4   :  { %v3272_v25 = vpop.f32.mrf.mxu0 }
0x24da   :  { %v3294_v47 = vpop.f32.mrf.mxu0 }
0x24db   :  { %v2571_v15 = vadd.f32 %v3294_v47, %v4172_v12 }
0x24dc   :  { %v2565_v27 = vpop.f32.mrf.mxu0 }
0x24dd   :  { %v2566_v29 = vadd.f32 %v4172_v12, %v2565_v27 }
0x24de   :  { %v3297_v37 = vpop.f32.mrf.mxu0 }
0x24df   :  { %3447 = vtanh.f32 %v2566_v29  ;;  %v2581_v49 = vadd.f32 %v3297_v37, %v4172_v12 }
0x24e0   :  { %v2575_v26 = vpop.f32.mrf.mxu0  ;;  %3449 = vtanh.f32 %v2571_v15 }
0x24e1   :  { %v2576_v39 = vadd.f32 %v4172_v12, %v2575_v26 }
0x24e2   :  { %v3300_v53 = vpop.f32.mrf.mxu0 }
0x24e3   :  { %3451 = vtanh.f32 %v2576_v39  ;;  %v2591_v48 = vadd.f32 %v3300_v53, %v4172_v12 }
0x24e4   :  { %v2585_v8 = vpop.f32.mrf.mxu0  ;;  %3453 = vtanh.f32 %v2581_v49 }
0x24e5   :  { %v2586_v33 = vadd.f32 %v4172_v12, %v2585_v8 }
0x24e7   :  { %3455 = vtanh.f32 %v2586_v33 }
0x24e8   :  { %3457 = vtanh.f32 %v2591_v48 }
0x24ec   :  { %v3448_v35 = vpop.eup %3447 }
0x24ed   :  { %v3450_v30 = vpop.eup %3449 }
0x24f0   :  { %v3452_v52 = vpop.eup %3451 }
0x24f1   :  { %v3454_v32 = vpop.eup %3453 }
0x24f4   :  { %v3456_v55 = vpop.eup %3455 }
0x24f5   :  { %v3458_v56 = vpop.eup %3457 }
0x2543   :  { %v2275_v31 = vpop.permute.xlu0 %2274 }
0x2544   :  { %2277 = vst.msk [vmem:[#allocation3 + $0x30] sm:$0xff] %vm80_vm1, %v2275_v31  ;;  %3282 = vmatmul.mubr.msk.f32.vlgmr.msra.gmra.mxu1 %vm80_vm1, %v2275_v31 }
0x2545   :  { %3305 = vmatpush3.msra.mxu1 %v2627_v18  ;;  %3336 = vmatprep.mubr.f32.mxu1 %v3448_v35 }
0x2546   :  { %3306 = vmatprep.subr.mxu1 %v2626_v34 }
0x2547   :  { %3307 = vmatpush3.msra.mxu1 %v2626_v34 }
0x2548   :  { %3308 = vmatprep.subr.mxu1 %v2625_v36 }
0x2549   :  { %3309 = vmatpush3.msra.mxu1 %v2625_v36 }
0x254a   :  { %3310 = vmatprep.subr.mxu1 %v2624_v54 }
0x254b   :  { %3311 = vmatpush3.msra.mxu1 %v2624_v54  ;;  %v2462_v24 = vld [vmem:[#allocation3 + $0x30] sm:$0xff] }
0x254c   :  { %3312 = vmatprep.subr.mxu1 %v2623_v38  ;;  %3301 = vmatprep.mubr.msk.f32.mxu0 %vm80_vm1, %v2462_v24 }
0x254d   :  { %3313 = vmatpush3.msra.mxu1 %v2623_v38 }
0x254e   :  { %3314 = vmatprep.subr.mxu1 %v2622_v40 }
0x254f   :  { %3315 = vmatpush3.msra.mxu1 %v2622_v40 }
0x2550   :  { %3316 = vmatprep.subr.mxu1 %v2621_v41 }
0x2551   :  { %3317 = vmatpush3.msra.mxu1 %v2621_v41 }
0x2552   :  { %3318 = vmatprep.subr.mxu1 %v2620_v42 }
0x2553   :  { %3319 = vmatpush3.msra.mxu1 %v2620_v42 }
0x2554   :  { %3320 = vmatprep.subr.mxu1 %v2619_v13 }
0x2555   :  { %3321 = vmatpush3.msra.mxu1 %v2619_v13 }
0x2556   :  { %3322 = vmatprep.subr.mxu1 %v2618_v43 }
0x2557   :  { %3323 = vmatpush3.msra.mxu1 %v2618_v43 }
0x2558   :  { %3324 = vmatprep.subr.mxu1 %v2617_v44 }
0x2559   :  { %3325 = vmatpush3.msra.mxu1 %v2617_v44 }
0x255a   :  { %3326 = vmatprep.subr.mxu1 %v2616_v46 }
0x255b   :  { %3327 = vmatpush3.msra.mxu1 %v2616_v46 }
0x255c   :  { %3328 = vmatprep.subr.mxu1 %v2615_v11 }
0x255d   :  { %3329 = vmatpush3.msra.mxu1 %v2615_v11 }
0x255e   :  { %3330 = vmatprep.subr.mxu1 %v2614_v0 }
0x255f   :  { %3331 = vmatpush3.msra.mxu1 %v2614_v0 }
0x2560   :  { %3332 = vmatprep.subr.mxu1 %v2613_v14 }
0x2561   :  { %3333 = vmatpush3.msra.mxu1 %v2613_v14 }
0x2562   :  { %3334 = vmatprep.subr.mxu1 %v2612_v50 }
0x2563   :  { %3335 = vmatpush3.msra.mxu1 %v2612_v50 }
0x2564   :  { %3337 = vmatmul.mubr.f32.vlgmr.msra.gmra.mxu1 %v3450_v30 }
0x2565   :  { %3339 = vmatprep.mubr.f32.mxu1 %v3452_v52 }
0x2568   :  { %3340 = vmatmul.mubr.f32.gmra.mxu1 %v3454_v32 }
0x2569   :  { %3342 = vmatprep.mubr.f32.mxu1 %v3456_v55 }
0x256c   :  { %3343 = vmatmul.mubr.f32.gmra.mxu1 %v3458_v56 }
0x2604   :  { %v2421_v57 = vpop.f32.mrf.mxu1 }
0x2605   :  { %v2422_v58 = vadd.f32 %v4003_v28, %v2421_v57 }
0x2606   :  { %v3283_v22 = vpop.f32.mrf.mxu1 }
0x2607   :  { %2433 = vrot.lane.b32.xlu0 %v2422_v58, %s3542_s25  ;;  %v2425_v10 = vadd.f32 %v2422_v58, %v2350_v4 }
0x2609   :  { %v2821_v17 = vmul.f32 -1.442695, %v2425_v10 }
0x260b   :  { %3459 = vpow2.f32 %v2821_v17 }
0x2618   :  { %v3460_v18 = vpop.eup %3459 }
0x2619   :  { %v2429_v5 = vadd.f32 1.0, %v3460_v18 }
0x261b   :  { %3461 = vrcp.f32 %v2429_v5 }
0x2624   :  { %v3338_v59 = vpop.f32.mrf.mxu1 }
0x2625   :  { %v2707_v60 = vadd.f32 %v3338_v59, %v2831_v45 }
0x2626   :  { %v2701_v6 = vpop.f32.mrf.mxu1 }
0x2627   :  { %2741 = vst [vmem:[#allocation9 + $0x8] sm:$0xff] %v2707_v60  ;;  %v2702_v61 = vadd.f32 %v2831_v45, %v2701_v6 }
0x2628   :  { %v3341_v16 = vpop.f32.mrf.mxu1  ;;  %v3462_v19 = vpop.eup %3461 }
0x2629   :  { %2740 = vst [vmem:[#allocation9] sm:$0xff] %v2702_v61  ;;  %v2717_v62 = vadd.f32 %v3341_v16, %v2831_v45  ;;  %v2443_v29 = vsub.f32 1.0, %v3462_v19  ;;  %v2449_v21 = vmul.f32 %v3462_v19, %v4163_v23 }
0x262a   :  { %v2711_v63 = vpop.f32.mrf.mxu1 }
0x262b   :  { %2743 = vst [vmem:[#allocation9 + $0x18] sm:$0xff] %v2717_v62  ;;  %v2712_v1 = vadd.f32 %v2831_v45, %v2711_v63 }
0x262c   :  { %v3344_v2 = vpop.f32.mrf.mxu1 }
0x262d   :  { %2742 = vst [vmem:[#allocation9 + $0x10] sm:$0xff] %v2712_v1  ;;  %v2727_v28 = vadd.f32 %v3344_v2, %v2831_v45 }
0x262e   :  { %v2721_v3 = vpop.f32.mrf.mxu1 }
0x262f   :  { %2745 = vst [vmem:[#allocation9 + $0x28] sm:$0xff] %v2727_v28  ;;  %v2722_v51 = vadd.f32 %v2831_v45, %v2721_v3 }
0x2631   :  { %2744 = vst [vmem:[#allocation9 + $0x20] sm:$0xff] %v2722_v51 }
0x2679   :  { %v2434_v20 = vpop.permute.xlu0 %2433 }
0x267a   :  { %v2436_v7 = vmul.f32 %v3462_v19, %v2434_v20 }
0x267c   :  { %2438 = vrot.lane.b32.xlu1 %v2436_v7, %s3542_s25  ;;  %s2753_s25 = sshll.u32 %s3544_s8, 4  ;;  %s2754_s25 = int_to_ptr.vmem [resolvable:$true] %s2753_s25 }
0x267d   :  { %p3515_p11 = scmp.lt.s32.totalorder %s2754_s25, %s2754_s25 }
0x26ee   :  { %v2439_v25 = vpop.permute.xlu1 %2438 }
0x26ef   :  { %v2441_v47 = vadd.f32 %v2439_v25, %v2350_v4 }
0x26f1   :  { %3463 = vtanh.f32 %v2441_v47 }
0x26fe   :  { %v3464_v27 = vpop.eup %3463 }
0x26ff   :  { %2445 = vrot.lane.b32.xlu0 %v3464_v27, %s3543_s26 }
0x2771   :  { %v2446_v31 = vpop.permute.xlu0 %2445 }
0x2772   :  { %v2448_v9 = vmul.f32 %v2446_v31, %v2443_v29 }
0x2774   :  { %v2450_v34 = vadd.f32 %v2449_v21, %v2448_v9 }
0x2776   :  { %2452 = vrot.lane.b32.xlu1 %v2450_v34, %s3543_s26  ;;  %s3510_s26 = scalar_lea.vmem %s2754_s25, 1024 }
0x2777   :  { %p3511_p10 = scmp.ne.s32.totalorder %s2754_s25, %s3510_s26  ;;  %p3516_p12 = scmp.lt.s32.totalorder %s3510_s26, %s3510_s26 }
0x2779   :  { %p3517_p13 = por %p3516_p12, %p3515_p11 }
0x277b   :  { %p3518_p0 = pnand %p3517_p13, %p3511_p10 }
0x27e8   :  { %v2453_v35 = vpop.permute.xlu1 %2452 }
0x27e9   :  { %2455 = vst.msk [vmem:[#allocation3 + $0x38] sm:$0xff] %vm80_vm1, %v2453_v35 }
0x27f0   :  { %v2463_v36 = vld [vmem:[#allocation3 + $0x38] sm:$0xff] }
0x27f1   :  { %3302 = vmatmul.mubr.msk.f32.gmra.mxu0 %vm80_vm1, %v2463_v36 }
0x28b1   :  { %v3303_v54 = vpop.f32.mrf.mxu0 }
0x28b2   :  { %v2601_v37 = vadd.f32 %v3303_v54, %v4172_v12 }
0x28b3   :  { %v2595_v38 = vpop.f32.mrf.mxu0 }
0x28b4   :  { %v2596_v24 = vadd.f32 %v4172_v12, %v2595_v38 }
0x28b6   :  { %3465 = vtanh.f32 %v2596_v24 }
0x28b7   :  { %3467 = vtanh.f32 %v2601_v37 }
0x28c3   :  { %v3466_v40 = vpop.eup %3465 }
0x28c4   :  { %v3468_v23 = vpop.eup %3467  ;;  %3345 = vmatprep.mubr.f32.mxu1 %v3466_v40 }
0x28c5   :  { %3346 = vmatmul.mubr.f32.gmra.mxu1 %v3468_v23 }
0x2985   :  { %v3347_v26 = vpop.f32.mrf.mxu1 }
0x2986   :  { %v2737_v41 = vadd.f32 %v3347_v26, %v2831_v45 }
0x2987   :  { %v2731_v42 = vpop.f32.mrf.mxu1 }
0x2988   :  { %2747 = vst [vmem:[#allocation9 + $0x38] sm:$0xff] %v2737_v41  ;;  %v2732_v53 = vadd.f32 %v2831_v45, %v2731_v42 }
0x298a   :  { %2746 = vst [vmem:[#allocation9 + $0x30] sm:$0xff] %v2732_v53 }
0x298b   :  { %3521 = shalt.err (!%p3518_p0)
}
0x298c   :  { %2759 = dma.vmem_to_hbm [thread:$0]  %s2754_s25, 1024, %s4213_s9, [#allocation6], %s3537_s12, %s3537_s12, %s3538_s13  }
0x298d   :  { %3534 = dma.done.wait [#allocation6], 1024  }
0x298e   :  { %3535 = vsyncadd [#allocation6], 4294966272 }
0x298f   :  { %2763 = vsyncpa [#allocation5], 1 }
0x2990   :  { %2764 = vsyncpa [#allocation8], 1 }
0x2991   :  { %2765 = vsyncpa [#allocation6], 1 }

</bundles_post_ra>
